<compile_context>
chip_gen: v7x
topology: tpu7x:2x2x1
jax: 0.10.0
libtpu: 0.0.40
codegen_flags: <defaults>
</compile_context>

<pallas_src>
import functools
from dataclasses import dataclass

import jax
import jax.numpy as jnp
from jax.experimental import pallas as pl
from jax.experimental.pallas import tpu as pltpu


# ----------------------------- config --------------------------------------
@dataclass(frozen=True)
class Cfg:
    feature_samples: int = 8
    pointwise: bool = True
    zero_clamp: bool = True
    stabalize: bool = False
    use_salience: bool = False
    pos_intra_shift: float = 0.18
    pos_inter_shift: float = 0.12
    neg_inter_shift: float = 0.46
    neg_samples: int = 2


# ------------------------- fused Pallas kernel -------------------------------
def _fused_kernel(lf_ref, lc_ref, rf_ref, rc_ref, seg_ref, shift_ref,
                  loss_ref, cd_ref, lsum_ref,
                  *, pointwise, zero_clamp, stabalize):
    """One grid step == one group of lane-concatenated pairs.

    lf_ref:   [N, P, Cf]   bf16, pre-normalized shared LHS features
    lc_ref:   [N, P, Cc]   bf16, pre-normalized shared LHS code
    rf_ref:   [1, N, Cf, PP] f32  RHS features of this group (PP = ppg * P)
    rc_ref:   [1, N, Cc, PP] f32  RHS code of this group
    seg_ref:  [PP, PP]     bf16, block-diagonal 1/P averaging constant
    shift_ref:[1, 1, PP]   f32, per-lane shift (constant per pair segment)
    loss_ref: [1, N, P, PP] f32  -clamp(cd) * (fd' - shift)
    cd_ref:   [1, N, P, PP] f32  code correlation
    lsum_ref: [1, 1, PP]   f32  per-lane loss sums (over n and rows)
    """
    N = lf_ref.shape[0]
    PP = rf_ref.shape[-1]
    eps2 = jnp.float32(1e-24)   # (F.normalize eps = 1e-12)^2
    min_val = 0.0 if zero_clamp else -9999.0

    def normalize_rhs(t):
        # t: [C, PP] f32; F.normalize(dim=channel): v * rsqrt(max(ss, eps^2))
        ss = jnp.sum(t * t, axis=0, keepdims=True)
        return (t * jax.lax.rsqrt(jnp.maximum(ss, eps2))).astype(jnp.bfloat16)

    def clamp(cd):
        if stabalize:
            return jnp.clip(cd, min_val, 0.8)
        return jnp.maximum(cd, min_val)

    shift = shift_ref[0]                               # [1, PP]
    gacc = jnp.zeros((1, PP), jnp.float32)             # per-pair global-mean acc
    lsum = jnp.zeros((1, PP), jnp.float32)             # per-lane loss sum acc

    # ---- pass 1: correlations, streamed per n straight into the output refs.
    for n in range(N):                                 # N tiny & static -> unrolled
        rf = normalize_rhs(rf_ref[0, n])               # [Cf, PP] bf16
        rc = normalize_rhs(rc_ref[0, n])               # [Cc, PP] bf16
        # LHS already normalized / bf16 / [P, C]: contraction on LHS minor dim.
        fd = jnp.dot(lf_ref[n], rf, preferred_element_type=jnp.float32)  # [P, PP]
        cd = jnp.dot(lc_ref[n], rc, preferred_element_type=jnp.float32)  # [P, PP]
        cd_ref[0, n] = cd
        if pointwise:
            # Per-pair (lane-segment of width P) row means via one bf16 MXU
            # matmul against the precomputed block-diagonal constant.
            rowmean = jnp.dot(fd.astype(jnp.bfloat16), seg_ref[...],
                              preferred_element_type=jnp.float32)        # [P, PP]
            # Each lane of rowmean holds its pair's row mean, so the mean over
            # rows (and later over n) gives that pair's global mean per lane.
            gacc = gacc + jnp.mean(rowmean, axis=0, keepdims=True)       # [1, PP]
            # Stage fd - rowmean; finalized in pass 2 (needs all-n gmean).
            loss_ref[0, n] = fd - rowmean
        else:
            cdc = clamp(cd)
            loss = -cdc * (fd - shift)
            loss_ref[0, n] = loss
            lsum = lsum + jnp.sum(loss, axis=0, keepdims=True)

    # ---- pass 2 (pointwise only): read staged fd'/cd back from VMEM, finalize.
    if pointwise:
        # original: fd - rowmean(fd) - mean(fd - rowmean) + mean(fd)
        #         == fd - rowmean + gmean   (inner mean is exactly 0)
        gmean = gacc * jnp.float32(1.0 / N)            # [1, PP]
        for n in range(N):
            fdp = loss_ref[0, n]                       # staged fd - rowmean
            cdc = clamp(cd_ref[0, n])
            loss = -cdc * (fdp + gmean - shift)
            loss_ref[0, n] = loss
            lsum = lsum + jnp.sum(loss, axis=0, keepdims=True)

    lsum_ref[0] = lsum


def _fused_contrastive(lhs_f, lhs_c, rhs_f, rhs_c, seg, shift_rows, cfg):
    """lhs_*: [N, P, C] bf16 (pre-normalized); rhs_*: [G, N, C, PP] f32;
    seg: [PP, PP] bf16; shift_rows: [G, 1, PP] f32."""
    G, N, Cf, PP = rhs_f.shape
    Cc = rhs_c.shape[2]
    P = lhs_f.shape[1]
    kern = functools.partial(_fused_kernel,
                             pointwise=cfg.pointwise,
                             zero_clamp=cfg.zero_clamp,
                             stabalize=cfg.stabalize)
    loss, cd, lsum = pl.pallas_call(
        kern,
        out_shape=(jax.ShapeDtypeStruct((G, N, P, PP), jnp.float32),
                   jax.ShapeDtypeStruct((G, N, P, PP), jnp.float32),
                   jax.ShapeDtypeStruct((G, 1, PP), jnp.float32)),
        grid_spec=pltpu.PrefetchScalarGridSpec(
            num_scalar_prefetch=0,
            grid=(G,),
            in_specs=[
                pl.BlockSpec((N, P, Cf), lambda g: (0, 0, 0)),       # shared LHS
                pl.BlockSpec((N, P, Cc), lambda g: (0, 0, 0)),
                pl.BlockSpec((1, N, Cf, PP), lambda g: (g, 0, 0, 0)),
                pl.BlockSpec((1, N, Cc, PP), lambda g: (g, 0, 0, 0)),
                pl.BlockSpec((PP, PP), lambda g: (0, 0)),            # constant seg
                pl.BlockSpec((1, 1, PP), lambda g: (g, 0, 0)),
            ],
            out_specs=[
                pl.BlockSpec((1, N, P, PP), lambda g: (g, 0, 0, 0)),
                pl.BlockSpec((1, N, P, PP), lambda g: (g, 0, 0, 0)),
                pl.BlockSpec((1, 1, PP), lambda g: (g, 0, 0)),
            ]),
        compiler_params=pltpu.CompilerParams(
            dimension_semantics=("parallel",)),
    )(lhs_f, lhs_c, rhs_f, rhs_c, seg, shift_rows)
    return loss, cd, lsum


def _num_groups(num_pairs):
    """v7x has 2 TensorCores -> keep 2 parallel grid steps; single-TC v5e/v6e
    fold everything into one step (less per-step overhead, 256-wide MXU N)."""
    try:
        kind = jax.devices()[0].device_kind.lower()
    except Exception:
        kind = ""
    if ("v7" in kind or "tpu7" in kind) and num_pairs % 2 == 0:
        return 2
    return 1


# --------------------------- JAX glue ---------------------------------------
def grid_sample(img, grid):
    """torch.nn.functional.grid_sample, bilinear, padding_mode='border',
    align_corners=True.  img: [N, C, H, W]; grid: [N, Hg, Wg, 2] (x, y)."""
    N, C, H, W = img.shape
    x = (grid[..., 0] + 1.0) * 0.5 * (W - 1)
    y = (grid[..., 1] + 1.0) * 0.5 * (H - 1)
    x = jnp.clip(x, 0.0, W - 1)   # border padding
    y = jnp.clip(y, 0.0, H - 1)
    x0 = jnp.floor(x)
    y0 = jnp.floor(y)
    wx = (x - x0)[:, None, :, :]
    wy = (y - y0)[:, None, :, :]
    x0i = jnp.clip(x0.astype(jnp.int32), 0, W - 1)
    y0i = jnp.clip(y0.astype(jnp.int32), 0, H - 1)
    x1i = jnp.clip(x0i + 1, 0, W - 1)
    y1i = jnp.clip(y0i + 1, 0, H - 1)

    gather = jax.vmap(lambda im, yy, xx: im[:, yy, xx])   # -> [N, C, Hg, Wg]
    v00 = gather(img, y0i, x0i)
    v01 = gather(img, y0i, x1i)
    v10 = gather(img, y1i, x0i)
    v11 = gather(img, y1i, x1i)
    return (v00 * (1 - wx) * (1 - wy) + v01 * wx * (1 - wy)
            + v10 * (1 - wx) * wy + v11 * wx * wy)


def stego_sample(t, coords):
    """STEGO `sample`: grid_sample(t, coords.permute(0, 2, 1, 3))."""
    return grid_sample(t, jnp.transpose(coords, (0, 2, 1, 3)))


def super_perm(key, size):
    perm = jax.random.permutation(key, size)
    perm = jnp.where(perm == jnp.arange(size), perm + 1, perm)
    return perm % size


class ContrastiveCorrelationLoss:
    def __init__(self, cfg: Cfg):
        self.cfg = cfg

    def forward(self, key, orig_feats, orig_feats_pos, orig_salience,
                orig_salience_pos, orig_code, orig_code_pos):
        cfg = self.cfg
        N = orig_feats.shape[0]
        S = cfg.feature_samples
        P = S * S
        coord_shape = (N, S, S, 2)

        k1, k2, kperm = jax.random.split(key, 3)

        if cfg.use_salience:
            # TODO(synk): salience-guided nonzero-location sampling (data-dependent
            # per-image loop) not implemented; only the use_salience=False path is.
            raise NotImplementedError("use_salience path not implemented")
        coords1 = jax.random.uniform(k1, coord_shape, jnp.float32) * 2.0 - 1.0
        coords2 = jax.random.uniform(k2, coord_shape, jnp.float32) * 2.0 - 1.0

        def flat(t):  # [N, C, S, S] -> [N, C, P] f32, channel-major
            n, c, s, _ = t.shape
            return t.reshape(n, c, s * s).astype(jnp.float32)

        feats = flat(stego_sample(orig_feats, coords1))
        code = flat(stego_sample(orig_code, coords1))
        feats_pos = flat(stego_sample(orig_feats_pos, coords2))
        code_pos = flat(stego_sample(orig_code_pos, coords2))

        # Shared LHS: normalize over channels ONCE, cast bf16, lay out [N, P, C]
        # so the in-kernel contraction is on the LHS minor dim.
        def norm_lhs(t):  # [N, C, P] -> [N, P, C] bf16
            ss = jnp.sum(t * t, axis=1, keepdims=True)
            tn = t * jax.lax.rsqrt(jnp.maximum(ss, jnp.float32(1e-24)))
            return jnp.transpose(tn, (0, 2, 1)).astype(jnp.bfloat16)

        lhs_f = norm_lhs(feats)
        lhs_c = norm_lhs(code)

        # RHS tensors / shifts for the 2 + neg_samples pairs (shared LHS).
        rhs_f_list = [feats, feats_pos]
        rhs_c_list = [code, code_pos]
        shifts = [cfg.pos_intra_shift, cfg.pos_inter_shift]
        perm_keys = jax.random.split(kperm, max(cfg.neg_samples, 1))
        for i in range(cfg.neg_samples):
            perm_neg = super_perm(perm_keys[i], N)
            rhs_f_list.append(flat(stego_sample(orig_feats[perm_neg], coords2)))
            rhs_c_list.append(flat(stego_sample(orig_code[perm_neg], coords2)))
            shifts.append(cfg.neg_inter_shift)

        num_pairs = len(rhs_f_list)
        G = _num_groups(num_pairs)
        ppg = num_pairs // G                   # pairs per grid step (lane-concat)
        PP = ppg * P

        rhs_f = jnp.stack(
            [jnp.concatenate(rhs_f_list[g * ppg:(g + 1) * ppg], axis=-1)
             for g in range(G)], axis=0)                       # [G, N, Cf, PP]
        rhs_c = jnp.stack(
            [jnp.concatenate(rhs_c_list[g * ppg:(g + 1) * ppg], axis=-1)
             for g in range(G)], axis=0)                       # [G, N, Cc, PP]
        shift_rows = jnp.stack(
            [jnp.concatenate([jnp.full((1, P), shifts[g * ppg + j], jnp.float32)
                              for j in range(ppg)], axis=-1)
             for g in range(G)], axis=0)                       # [G, 1, PP]

        # Block-diagonal 1/P averaging constant (built once, resident in-kernel).
        seg_idx = jnp.arange(PP) // P
        seg = ((seg_idx[:, None] == seg_idx[None, :]).astype(jnp.float32)
               * jnp.float32(1.0 / P)).astype(jnp.bfloat16)    # [PP, PP]

        loss_all, cd_all, lsum_all = _fused_contrastive(
            lhs_f, lhs_c, rhs_f, rhs_c, seg, shift_rows, cfg)

        def unpack(arr, k):      # pair index k -> [N, S, S, S, S]
            g, j = divmod(k, ppg)
            blk = arr[g, :, :, j * P:(j + 1) * P]
            return blk.reshape(N, S, S, S, S)

        def pair_mean(k):        # mean of loss for pair k from in-kernel sums
            g, j = divmod(k, ppg)
            return jnp.sum(lsum_all[g, 0, j * P:(j + 1) * P]) / (N * P * P)

        pos_intra_loss_mean = pair_mean(0)
        pos_intra_cd = unpack(cd_all, 0)
        pos_inter_loss_mean = pair_mean(1)
        pos_inter_cd = unpack(cd_all, 1)
        neg_losses = [unpack(loss_all, 2 + i) for i in range(cfg.neg_samples)]
        neg_cds = [unpack(cd_all, 2 + i) for i in range(cfg.neg_samples)]
        neg_inter_loss = jnp.concatenate(neg_losses, axis=0)
        neg_inter_cd = jnp.concatenate(neg_cds, axis=0)

        return (pos_intra_loss_mean, pos_intra_cd,
                pos_inter_loss_mean, pos_inter_cd,
                neg_inter_loss, neg_inter_cd)

    __call__ = forward


# ------------------------------ main -----------------------------------------
if __name__ == "__main__":
    cfg = Cfg()
    key = jax.random.PRNGKey(0)
    ks = jax.random.split(key, 7)

    N, Cf, Cc, H = 2, 32, 16, 16
    orig_feats = jax.random.normal(ks[0], (N, Cf, H, H), jnp.float32)
    orig_feats_pos = jax.random.normal(ks[1], (N, Cf, H, H), jnp.float32)
    orig_salience = jax.random.uniform(ks[2], (N, H, H), jnp.float32)
    orig_salience_pos = jax.random.uniform(ks[3], (N, H, H), jnp.float32)
    orig_code = jax.random.normal(ks[4], (N, Cc, H, H), jnp.float32)
    orig_code_pos = jax.random.normal(ks[5], (N, Cc, H, H), jnp.float32)

    loss_mod = ContrastiveCorrelationLoss(cfg)
    out = loss_mod(ks[6], orig_feats, orig_feats_pos, orig_salience,
                   orig_salience_pos, orig_code, orig_code_pos)
    out = jax.block_until_ready(out)

    (pos_intra_loss, pos_intra_cd, pos_inter_loss, pos_inter_cd,
     neg_inter_loss, neg_inter_cd) = out
    S = cfg.feature_samples
    assert pos_intra_cd.shape == (N, S, S, S, S)
    assert pos_inter_cd.shape == (N, S, S, S, S)
    assert neg_inter_loss.shape == (N * cfg.neg_samples, S, S, S, S)
    assert neg_inter_cd.shape == (N * cfg.neg_samples, S, S, S, S)
    assert jnp.isfinite(pos_intra_loss) and jnp.isfinite(pos_inter_loss)
    assert bool(jnp.all(jnp.isfinite(neg_inter_loss)))
    assert bool(jnp.all(jnp.isfinite(pos_intra_cd)))
    print("KERNEL_OK")
</pallas_src>

<mosaic_0001>
module attributes {stable_mosaic.version = 11 : i64} {
  func.func @_fused_kernel(%arg0: i32, %arg1: memref<2x64x32xbf16, #tpu.memory_space<vmem>>, %arg2: memref<2x64x16xbf16, #tpu.memory_space<vmem>>, %arg3: memref<1x2x32x256xf32, #tpu.memory_space<vmem>>, %arg4: memref<1x2x16x256xf32, #tpu.memory_space<vmem>>, %arg5: memref<256x256xbf16, #tpu.memory_space<vmem>>, %arg6: memref<1x1x256xf32, #tpu.memory_space<vmem>>, %arg7: memref<1x2x64x256xf32, #tpu.memory_space<vmem>>, %arg8: memref<1x2x64x256xf32, #tpu.memory_space<vmem>>, %arg9: memref<1x1x256xf32, #tpu.memory_space<vmem>>) attributes {dimension_semantics = [#tpu.dimension_semantics<parallel>], iteration_bounds = array<i64: 1>, scalar_prefetch = 0 : i64, scratch_operands = 0 : i64, tpu.core_type = #tpu.core_type<tc>, window_params = [{pipeline_mode = #tpu.pipeline_mode<synchronous>, transform_indices = @transform_0, window_bounds = array<i64: 2, 64, 32>}, {pipeline_mode = #tpu.pipeline_mode<synchronous>, transform_indices = @transform_1, window_bounds = array<i64: 2, 64, 16>}, {transform_indices = @transform_2, window_bounds = array<i64: 1, 2, 32, 256>}, {transform_indices = @transform_3, window_bounds = array<i64: 1, 2, 16, 256>}, {pipeline_mode = #tpu.pipeline_mode<synchronous>, transform_indices = @transform_4, window_bounds = array<i64: 256, 256>}, {transform_indices = @transform_5, window_bounds = array<i64: 1, 1, 256>}, {transform_indices = @transform_6, window_bounds = array<i64: 1, 2, 64, 256>}, {transform_indices = @transform_7, window_bounds = array<i64: 1, 2, 64, 256>}, {transform_indices = @transform_8, window_bounds = array<i64: 1, 1, 256>}]} {
    %c0 = arith.constant 0 : index
    %c0_0 = arith.constant 0 : index
    %c0_1 = arith.constant 0 : index
    %0 = vector.load %arg6[%c0, %c0_0, %c0_1] : memref<1x1x256xf32, #tpu.memory_space<vmem>>, vector<1x1x256xf32>
    %1 = vector.shape_cast %0 : vector<1x1x256xf32> to vector<1x256xf32>
    %cst = arith.constant 0.000000e+00 : f32
    %2 = vector.broadcast %cst : f32 to vector<1x256xf32>
    %cst_2 = arith.constant 0.000000e+00 : f32
    %3 = vector.broadcast %cst_2 : f32 to vector<1x256xf32>
    %c0_3 = arith.constant 0 : index
    %c0_4 = arith.constant 0 : index
    %c0_5 = arith.constant 0 : index
    %c0_6 = arith.constant 0 : index
    %4 = vector.load %arg3[%c0_3, %c0_4, %c0_5, %c0_6] : memref<1x2x32x256xf32, #tpu.memory_space<vmem>>, vector<1x1x32x256xf32>
    %5 = vector.shape_cast %4 : vector<1x1x32x256xf32> to vector<32x256xf32>
    %6 = arith.mulf %5, %5 : vector<32x256xf32>
    %cst_7 = arith.constant dense<0.000000e+00> : vector<256xf32>
    %7 = vector.multi_reduction <add>, %6, %cst_7 [0] : vector<32x256xf32> to vector<256xf32>
    %8 = vector.shape_cast %7 : vector<256xf32> to vector<1x256xf32>
    %cst_8 = arith.constant 1.000000e-24 : f32
    %9 = vector.broadcast %cst_8 : f32 to vector<1x256xf32>
    %10 = arith.maximumf %8, %9 : vector<1x256xf32>
    %11 = math.rsqrt %10 : vector<1x256xf32>
    %12 = vector.broadcast %11 : vector<1x256xf32> to vector<32x256xf32>
    %13 = arith.mulf %5, %12 : vector<32x256xf32>
    %14 = arith.truncf %13 : vector<32x256xf32> to vector<32x256xbf16>
    %c0_9 = arith.constant 0 : index
    %c0_10 = arith.constant 0 : index
    %c0_11 = arith.constant 0 : index
    %c0_12 = arith.constant 0 : index
    %15 = vector.load %arg4[%c0_9, %c0_10, %c0_11, %c0_12] : memref<1x2x16x256xf32, #tpu.memory_space<vmem>>, vector<1x1x16x256xf32>
    %16 = vector.shape_cast %15 : vector<1x1x16x256xf32> to vector<16x256xf32>
    %17 = arith.mulf %16, %16 : vector<16x256xf32>
    %cst_13 = arith.constant dense<0.000000e+00> : vector<256xf32>
    %18 = vector.multi_reduction <add>, %17, %cst_13 [0] : vector<16x256xf32> to vector<256xf32>
    %19 = vector.shape_cast %18 : vector<256xf32> to vector<1x256xf32>
    %cst_14 = arith.constant 1.000000e-24 : f32
    %20 = vector.broadcast %cst_14 : f32 to vector<1x256xf32>
    %21 = arith.maximumf %19, %20 : vector<1x256xf32>
    %22 = math.rsqrt %21 : vector<1x256xf32>
    %23 = vector.broadcast %22 : vector<1x256xf32> to vector<16x256xf32>
    %24 = arith.mulf %16, %23 : vector<16x256xf32>
    %25 = arith.truncf %24 : vector<16x256xf32> to vector<16x256xbf16>
    %c0_15 = arith.constant 0 : index
    %c0_16 = arith.constant 0 : index
    %c0_17 = arith.constant 0 : index
    %26 = vector.load %arg1[%c0_15, %c0_16, %c0_17] : memref<2x64x32xbf16, #tpu.memory_space<vmem>>, vector<1x64x32xbf16>
    %27 = vector.shape_cast %26 : vector<1x64x32xbf16> to vector<64x32xbf16>
    %cst_18 = arith.constant dense<0.000000e+00> : vector<64x256xf32>
    %28 = tpu.matmul %27, %14, %cst_18 {dimension_numbers = #tpu.dot_dimension_numbers<[1], [0], [0], [1], [0, 0, 1, 1], [], []>} : vector<64x32xbf16>, vector<32x256xbf16>, vector<64x256xf32> -> vector<64x256xf32>
    %c0_19 = arith.constant 0 : index
    %c0_20 = arith.constant 0 : index
    %c0_21 = arith.constant 0 : index
    %29 = vector.load %arg2[%c0_19, %c0_20, %c0_21] : memref<2x64x16xbf16, #tpu.memory_space<vmem>>, vector<1x64x16xbf16>
    %30 = vector.shape_cast %29 : vector<1x64x16xbf16> to vector<64x16xbf16>
    %cst_22 = arith.constant dense<0.000000e+00> : vector<64x256xf32>
    %31 = tpu.matmul %30, %25, %cst_22 {dimension_numbers = #tpu.dot_dimension_numbers<[1], [0], [0], [1], [0, 0, 1, 1], [], []>} : vector<64x16xbf16>, vector<16x256xbf16>, vector<64x256xf32> -> vector<64x256xf32>
    %c0_23 = arith.constant 0 : index
    %c0_24 = arith.constant 0 : index
    %c0_25 = arith.constant 0 : index
    %c0_26 = arith.constant 0 : index
    %32 = vector.load %arg8[%c0_23, %c0_24, %c0_25, %c0_26] : memref<1x2x64x256xf32, #tpu.memory_space<vmem>>, vector<1x1x64x256xf32>
    %33 = vector.shape_cast %32 : vector<1x1x64x256xf32> to vector<64x256xf32>
    %34 = vector.shape_cast %31 : vector<64x256xf32> to vector<1x1x64x256xf32>
    tpu.vector_store %arg8[%c0_23, %c0_24, %c0_25, %c0_26], %34 {strides = array<i32>} : memref<1x2x64x256xf32, #tpu.memory_space<vmem>>, vector<1x1x64x256xf32>,
    %35 = arith.truncf %28 : vector<64x256xf32> to vector<64x256xbf16>
    %c0_27 = arith.constant 0 : index
    %c0_28 = arith.constant 0 : index
    %36 = vector.load %arg5[%c0_27, %c0_28] : memref<256x256xbf16, #tpu.memory_space<vmem>>, vector<256x256xbf16>
    %cst_29 = arith.constant dense<0.000000e+00> : vector<64x256xf32>
    %37 = tpu.matmul %35, %36, %cst_29 {dimension_numbers = #tpu.dot_dimension_numbers<[1], [0], [0], [1], [0, 0, 1, 1], [], []>} : vector<64x256xbf16>, vector<256x256xbf16>, vector<64x256xf32> -> vector<64x256xf32>
    %cst_30 = arith.constant dense<0.000000e+00> : vector<256xf32>
    %38 = vector.multi_reduction <add>, %37, %cst_30 [0] : vector<64x256xf32> to vector<256xf32>
    %39 = vector.shape_cast %38 : vector<256xf32> to vector<1x256xf32>
    %cst_31 = arith.constant 6.400000e+01 : f32
    %40 = vector.broadcast %cst_31 : f32 to vector<1x256xf32>
    %41 = arith.divf %39, %40 : vector<1x256xf32>
    %42 = arith.addf %2, %41 : vector<1x256xf32>
    %43 = arith.subf %28, %37 : vector<64x256xf32>
    %c0_32 = arith.constant 0 : index
    %c0_33 = arith.constant 0 : index
    %c0_34 = arith.constant 0 : index
    %c0_35 = arith.constant 0 : index
    %44 = vector.load %arg7[%c0_32, %c0_33, %c0_34, %c0_35] : memref<1x2x64x256xf32, #tpu.memory_space<vmem>>, vector<1x1x64x256xf32>
    %45 = vector.shape_cast %44 : vector<1x1x64x256xf32> to vector<64x256xf32>
    %46 = vector.shape_cast %43 : vector<64x256xf32> to vector<1x1x64x256xf32>
    tpu.vector_store %arg7[%c0_32, %c0_33, %c0_34, %c0_35], %46 {strides = array<i32>} : memref<1x2x64x256xf32, #tpu.memory_space<vmem>>, vector<1x1x64x256xf32>,
    %c0_36 = arith.constant 0 : index
    %c1 = arith.constant 1 : index
    %c0_37 = arith.constant 0 : index
    %c0_38 = arith.constant 0 : index
    %47 = vector.load %arg3[%c0_36, %c1, %c0_37, %c0_38] : memref<1x2x32x256xf32, #tpu.memory_space<vmem>>, vector<1x1x32x256xf32>
    %48 = vector.shape_cast %47 : vector<1x1x32x256xf32> to vector<32x256xf32>
    %49 = arith.mulf %48, %48 : vector<32x256xf32>
    %cst_39 = arith.constant dense<0.000000e+00> : vector<256xf32>
    %50 = vector.multi_reduction <add>, %49, %cst_39 [0] : vector<32x256xf32> to vector<256xf32>
    %51 = vector.shape_cast %50 : vector<256xf32> to vector<1x256xf32>
    %cst_40 = arith.constant 1.000000e-24 : f32
    %52 = vector.broadcast %cst_40 : f32 to vector<1x256xf32>
    %53 = arith.maximumf %51, %52 : vector<1x256xf32>
    %54 = math.rsqrt %53 : vector<1x256xf32>
    %55 = vector.broadcast %54 : vector<1x256xf32> to vector<32x256xf32>
    %56 = arith.mulf %48, %55 : vector<32x256xf32>
    %57 = arith.truncf %56 : vector<32x256xf32> to vector<32x256xbf16>
    %c0_41 = arith.constant 0 : index
    %c1_42 = arith.constant 1 : index
    %c0_43 = arith.constant 0 : index
    %c0_44 = arith.constant 0 : index
    %58 = vector.load %arg4[%c0_41, %c1_42, %c0_43, %c0_44] : memref<1x2x16x256xf32, #tpu.memory_space<vmem>>, vector<1x1x16x256xf32>
    %59 = vector.shape_cast %58 : vector<1x1x16x256xf32> to vector<16x256xf32>
    %60 = arith.mulf %59, %59 : vector<16x256xf32>
    %cst_45 = arith.constant dense<0.000000e+00> : vector<256xf32>
    %61 = vector.multi_reduction <add>, %60, %cst_45 [0] : vector<16x256xf32> to vector<256xf32>
    %62 = vector.shape_cast %61 : vector<256xf32> to vector<1x256xf32>
    %cst_46 = arith.constant 1.000000e-24 : f32
    %63 = vector.broadcast %cst_46 : f32 to vector<1x256xf32>
    %64 = arith.maximumf %62, %63 : vector<1x256xf32>
    %65 = math.rsqrt %64 : vector<1x256xf32>
    %66 = vector.broadcast %65 : vector<1x256xf32> to vector<16x256xf32>
    %67 = arith.mulf %59, %66 : vector<16x256xf32>
    %68 = arith.truncf %67 : vector<16x256xf32> to vector<16x256xbf16>
    %c1_47 = arith.constant 1 : index
    %c0_48 = arith.constant 0 : index
    %c0_49 = arith.constant 0 : index
    %69 = vector.load %arg1[%c1_47, %c0_48, %c0_49] : memref<2x64x32xbf16, #tpu.memory_space<vmem>>, vector<1x64x32xbf16>
    %70 = vector.shape_cast %69 : vector<1x64x32xbf16> to vector<64x32xbf16>
    %cst_50 = arith.constant dense<0.000000e+00> : vector<64x256xf32>
    %71 = tpu.matmul %70, %57, %cst_50 {dimension_numbers = #tpu.dot_dimension_numbers<[1], [0], [0], [1], [0, 0, 1, 1], [], []>} : vector<64x32xbf16>, vector<32x256xbf16>, vector<64x256xf32> -> vector<64x256xf32>
    %c1_51 = arith.constant 1 : index
    %c0_52 = arith.constant 0 : index
    %c0_53 = arith.constant 0 : index
    %72 = vector.load %arg2[%c1_51, %c0_52, %c0_53] : memref<2x64x16xbf16, #tpu.memory_space<vmem>>, vector<1x64x16xbf16>
    %73 = vector.shape_cast %72 : vector<1x64x16xbf16> to vector<64x16xbf16>
    %cst_54 = arith.constant dense<0.000000e+00> : vector<64x256xf32>
    %74 = tpu.matmul %73, %68, %cst_54 {dimension_numbers = #tpu.dot_dimension_numbers<[1], [0], [0], [1], [0, 0, 1, 1], [], []>} : vector<64x16xbf16>, vector<16x256xbf16>, vector<64x256xf32> -> vector<64x256xf32>
    %c0_55 = arith.constant 0 : index
    %c1_56 = arith.constant 1 : index
    %c0_57 = arith.constant 0 : index
    %c0_58 = arith.constant 0 : index
    %75 = vector.load %arg8[%c0_55, %c1_56, %c0_57, %c0_58] : memref<1x2x64x256xf32, #tpu.memory_space<vmem>>, vector<1x1x64x256xf32>
    %76 = vector.shape_cast %75 : vector<1x1x64x256xf32> to vector<64x256xf32>
    %77 = vector.shape_cast %74 : vector<64x256xf32> to vector<1x1x64x256xf32>
    tpu.vector_store %arg8[%c0_55, %c1_56, %c0_57, %c0_58], %77 {strides = array<i32>} : memref<1x2x64x256xf32, #tpu.memory_space<vmem>>, vector<1x1x64x256xf32>,
    %78 = arith.truncf %71 : vector<64x256xf32> to vector<64x256xbf16>
    %c0_59 = arith.constant 0 : index
    %c0_60 = arith.constant 0 : index
    %79 = vector.load %arg5[%c0_59, %c0_60] : memref<256x256xbf16, #tpu.memory_space<vmem>>, vector<256x256xbf16>
    %cst_61 = arith.constant dense<0.000000e+00> : vector<64x256xf32>
    %80 = tpu.matmul %78, %79, %cst_61 {dimension_numbers = #tpu.dot_dimension_numbers<[1], [0], [0], [1], [0, 0, 1, 1], [], []>} : vector<64x256xbf16>, vector<256x256xbf16>, vector<64x256xf32> -> vector<64x256xf32>
    %cst_62 = arith.constant dense<0.000000e+00> : vector<256xf32>
    %81 = vector.multi_reduction <add>, %80, %cst_62 [0] : vector<64x256xf32> to vector<256xf32>
    %82 = vector.shape_cast %81 : vector<256xf32> to vector<1x256xf32>
    %cst_63 = arith.constant 6.400000e+01 : f32
    %83 = vector.broadcast %cst_63 : f32 to vector<1x256xf32>
    %84 = arith.divf %82, %83 : vector<1x256xf32>
    %85 = arith.addf %42, %84 : vector<1x256xf32>
    %86 = arith.subf %71, %80 : vector<64x256xf32>
    %c0_64 = arith.constant 0 : index
    %c1_65 = arith.constant 1 : index
    %c0_66 = arith.constant 0 : index
    %c0_67 = arith.constant 0 : index
    %87 = vector.load %arg7[%c0_64, %c1_65, %c0_66, %c0_67] : memref<1x2x64x256xf32, #tpu.memory_space<vmem>>, vector<1x1x64x256xf32>
    %88 = vector.shape_cast %87 : vector<1x1x64x256xf32> to vector<64x256xf32>
    %89 = vector.shape_cast %86 : vector<64x256xf32> to vector<1x1x64x256xf32>
    tpu.vector_store %arg7[%c0_64, %c1_65, %c0_66, %c0_67], %89 {strides = array<i32>} : memref<1x2x64x256xf32, #tpu.memory_space<vmem>>, vector<1x1x64x256xf32>,
    %cst_68 = arith.constant 5.000000e-01 : f32
    %90 = vector.broadcast %cst_68 : f32 to vector<1x256xf32>
    %91 = arith.mulf %85, %90 : vector<1x256xf32>
    %c0_69 = arith.constant 0 : index
    %c0_70 = arith.constant 0 : index
    %c0_71 = arith.constant 0 : index
    %c0_72 = arith.constant 0 : index
    %92 = vector.load %arg7[%c0_69, %c0_70, %c0_71, %c0_72] : memref<1x2x64x256xf32, #tpu.memory_space<vmem>>, vector<1x1x64x256xf32>
    %93 = vector.shape_cast %92 : vector<1x1x64x256xf32> to vector<64x256xf32>
    %c0_73 = arith.constant 0 : index
    %c0_74 = arith.constant 0 : index
    %c0_75 = arith.constant 0 : index
    %c0_76 = arith.constant 0 : index
    %94 = vector.load %arg8[%c0_73, %c0_74, %c0_75, %c0_76] : memref<1x2x64x256xf32, #tpu.memory_space<vmem>>, vector<1x1x64x256xf32>
    %95 = vector.shape_cast %94 : vector<1x1x64x256xf32> to vector<64x256xf32>
    %cst_77 = arith.constant 0.000000e+00 : f32
    %96 = vector.broadcast %cst_77 : f32 to vector<64x256xf32>
    %97 = arith.maximumf %95, %96 : vector<64x256xf32>
    %cst_78 = arith.constant 0.000000e+00 : f32
    %98 = vector.broadcast %cst_78 : f32 to vector<64x256xf32>
    %99 = arith.subf %98, %97 : vector<64x256xf32>
    %100 = vector.broadcast %91 : vector<1x256xf32> to vector<64x256xf32>
    %101 = arith.addf %93, %100 : vector<64x256xf32>
    %102 = vector.broadcast %1 : vector<1x256xf32> to vector<64x256xf32>
    %103 = arith.subf %101, %102 : vector<64x256xf32>
    %104 = arith.mulf %99, %103 : vector<64x256xf32>
    %c0_79 = arith.constant 0 : index
    %c0_80 = arith.constant 0 : index
    %c0_81 = arith.constant 0 : index
    %c0_82 = arith.constant 0 : index
    %105 = vector.load %arg7[%c0_79, %c0_80, %c0_81, %c0_82] : memref<1x2x64x256xf32, #tpu.memory_space<vmem>>, vector<1x1x64x256xf32>
    %106 = vector.shape_cast %105 : vector<1x1x64x256xf32> to vector<64x256xf32>
    %107 = vector.shape_cast %104 : vector<64x256xf32> to vector<1x1x64x256xf32>
    tpu.vector_store %arg7[%c0_79, %c0_80, %c0_81, %c0_82], %107 {strides = array<i32>} : memref<1x2x64x256xf32, #tpu.memory_space<vmem>>, vector<1x1x64x256xf32>,
    %cst_83 = arith.constant dense<0.000000e+00> : vector<256xf32>
    %108 = vector.multi_reduction <add>, %104, %cst_83 [0] : vector<64x256xf32> to vector<256xf32>
    %109 = vector.shape_cast %108 : vector<256xf32> to vector<1x256xf32>
    %110 = arith.addf %3, %109 : vector<1x256xf32>
    %c0_84 = arith.constant 0 : index
    %c1_85 = arith.constant 1 : index
    %c0_86 = arith.constant 0 : index
    %c0_87 = arith.constant 0 : index
    %111 = vector.load %arg7[%c0_84, %c1_85, %c0_86, %c0_87] : memref<1x2x64x256xf32, #tpu.memory_space<vmem>>, vector<1x1x64x256xf32>
    %112 = vector.shape_cast %111 : vector<1x1x64x256xf32> to vector<64x256xf32>
    %c0_88 = arith.constant 0 : index
    %c1_89 = arith.constant 1 : index
    %c0_90 = arith.constant 0 : index
    %c0_91 = arith.constant 0 : index
    %113 = vector.load %arg8[%c0_88, %c1_89, %c0_90, %c0_91] : memref<1x2x64x256xf32, #tpu.memory_space<vmem>>, vector<1x1x64x256xf32>
    %114 = vector.shape_cast %113 : vector<1x1x64x256xf32> to vector<64x256xf32>
    %cst_92 = arith.constant 0.000000e+00 : f32
    %115 = vector.broadcast %cst_92 : f32 to vector<64x256xf32>
    %116 = arith.maximumf %114, %115 : vector<64x256xf32>
    %cst_93 = arith.constant 0.000000e+00 : f32
    %117 = vector.broadcast %cst_93 : f32 to vector<64x256xf32>
    %118 = arith.subf %117, %116 : vector<64x256xf32>
    %119 = vector.broadcast %91 : vector<1x256xf32> to vector<64x256xf32>
    %120 = arith.addf %112, %119 : vector<64x256xf32>
    %121 = vector.broadcast %1 : vector<1x256xf32> to vector<64x256xf32>
    %122 = arith.subf %120, %121 : vector<64x256xf32>
    %123 = arith.mulf %118, %122 : vector<64x256xf32>
    %c0_94 = arith.constant 0 : index
    %c1_95 = arith.constant 1 : index
    %c0_96 = arith.constant 0 : index
    %c0_97 = arith.constant 0 : index
    %124 = vector.load %arg7[%c0_94, %c1_95, %c0_96, %c0_97] : memref<1x2x64x256xf32, #tpu.memory_space<vmem>>, vector<1x1x64x256xf32>
    %125 = vector.shape_cast %124 : vector<1x1x64x256xf32> to vector<64x256xf32>
    %126 = vector.shape_cast %123 : vector<64x256xf32> to vector<1x1x64x256xf32>
    tpu.vector_store %arg7[%c0_94, %c1_95, %c0_96, %c0_97], %126 {strides = array<i32>} : memref<1x2x64x256xf32, #tpu.memory_space<vmem>>, vector<1x1x64x256xf32>,
    %cst_98 = arith.constant dense<0.000000e+00> : vector<256xf32>
    %127 = vector.multi_reduction <add>, %123, %cst_98 [0] : vector<64x256xf32> to vector<256xf32>
    %128 = vector.shape_cast %127 : vector<256xf32> to vector<1x256xf32>
    %129 = arith.addf %110, %128 : vector<1x256xf32>
    %c0_99 = arith.constant 0 : index
    %c0_100 = arith.constant 0 : index
    %c0_101 = arith.constant 0 : index
    %130 = vector.load %arg9[%c0_99, %c0_100, %c0_101] : memref<1x1x256xf32, #tpu.memory_space<vmem>>, vector<1x1x256xf32>
    %131 = vector.shape_cast %130 : vector<1x1x256xf32> to vector<1x256xf32>
    %132 = vector.shape_cast %129 : vector<1x256xf32> to vector<1x1x256xf32>
    tpu.vector_store %arg9[%c0_99, %c0_100, %c0_101], %132 {strides = array<i32>} : memref<1x1x256xf32, #tpu.memory_space<vmem>>, vector<1x1x256xf32>,
    return
  }
  func.func @transform_0(%arg0: i32) -> (i32, i32, i32) {
    %c0_i32 = arith.constant 0 : i32
    %c0_i32_0 = arith.constant 0 : i32
    %c0_i32_1 = arith.constant 0 : i32
    %c0_i32_2 = arith.constant 0 : i32
    return %c0_i32, %c0_i32_0, %c0_i32_1 : i32, i32, i32
  }
  func.func @transform_1(%arg0: i32) -> (i32, i32, i32) {
    %c0_i32 = arith.constant 0 : i32
    %c0_i32_0 = arith.constant 0 : i32
    %c0_i32_1 = arith.constant 0 : i32
    %c0_i32_2 = arith.constant 0 : i32
    return %c0_i32, %c0_i32_0, %c0_i32_1 : i32, i32, i32
  }
  func.func @transform_2(%arg0: i32) -> (i32, i32, i32, i32) {
    %c0_i32 = arith.constant 0 : i32
    %c0_i32_0 = arith.constant 0 : i32
    %c0_i32_1 = arith.constant 0 : i32
    %c0_i32_2 = arith.constant 0 : i32
    return %arg0, %c0_i32, %c0_i32_0, %c0_i32_1 : i32, i32, i32, i32
  }
  func.func @transform_3(%arg0: i32) -> (i32, i32, i32, i32) {
    %c0_i32 = arith.constant 0 : i32
    %c0_i32_0 = arith.constant 0 : i32
    %c0_i32_1 = arith.constant 0 : i32
    %c0_i32_2 = arith.constant 0 : i32
    return %arg0, %c0_i32, %c0_i32_0, %c0_i32_1 : i32, i32, i32, i32
  }
  func.func @transform_4(%arg0: i32) -> (i32, i32) {
    %c0_i32 = arith.constant 0 : i32
    %c0_i32_0 = arith.constant 0 : i32
    %c0_i32_1 = arith.constant 0 : i32
    return %c0_i32, %c0_i32_0 : i32, i32
  }
  func.func @transform_5(%arg0: i32) -> (i32, i32, i32) {
    %c0_i32 = arith.constant 0 : i32
    %c0_i32_0 = arith.constant 0 : i32
    %c0_i32_1 = arith.constant 0 : i32
    return %arg0, %c0_i32, %c0_i32_0 : i32, i32, i32
  }
  func.func @transform_6(%arg0: i32) -> (i32, i32, i32, i32) {
    %c0_i32 = arith.constant 0 : i32
    %c0_i32_0 = arith.constant 0 : i32
    %c0_i32_1 = arith.constant 0 : i32
    %c0_i32_2 = arith.constant 0 : i32
    return %arg0, %c0_i32, %c0_i32_0, %c0_i32_1 : i32, i32, i32, i32
  }
  func.func @transform_7(%arg0: i32) -> (i32, i32, i32, i32) {
    %c0_i32 = arith.constant 0 : i32
    %c0_i32_0 = arith.constant 0 : i32
    %c0_i32_1 = arith.constant 0 : i32
    %c0_i32_2 = arith.constant 0 : i32
    return %arg0, %c0_i32, %c0_i32_0, %c0_i32_1 : i32, i32, i32, i32
  }
  func.func @transform_8(%arg0: i32) -> (i32, i32, i32) {
    %c0_i32 = arith.constant 0 : i32
    %c0_i32_0 = arith.constant 0 : i32
    %c0_i32_1 = arith.constant 0 : i32
    return %arg0, %c0_i32, %c0_i32_0 : i32, i32, i32
  }
}

</mosaic_0001>

<bundles_post_ra>
// kernel: tpu_custom_call.1
= control target key start
LH: loop header
LB: loop body
LE: loop exit
PB: predicated region body
PF: predicated region fallthrough
CT: control target
= control target key end

     0   :  { %14 = vsyncpa [#allocation3], 0  ;;  %s3374_s0 = inlined_call_operand.vmem [shape: bf16[2,64,32], index: 0, kind: input, shape index: {}]   ;;  %s3375_s1 = inlined_call_operand.vmem [shape: bf16[2,64,16], index: 1, kind: input, shape index: {}]   ;;  %s3376_s2 = inlined_call_operand.vmem [shape: f32[1,2,32,256], index: 2, kind: input, shape index: {}]   ;;  %s3377_s3 = inlined_call_operand.hbm [shape: f32[1,2,16,256], index: 3, kind: input, shape index: {}]   ;;  %s3378_s4 = inlined_call_operand.hbm [shape: bf16[256,256], index: 4, kind: input, shape index: {}]   ;;  %s3379_s5 = inlined_call_operand.vmem [shape: f32[1,1,256], index: 5, kind: input, shape index: {}]   ;;  %s3380_s6 = inlined_call_operand.hbm [shape: f32[1,2,64,256], index: 6, kind: output, shape index: {0}]   ;;  %s3381_s7 = inlined_call_operand.hbm [shape: f32[1,2,64,256], index: 7, kind: output, shape index: {1}]   ;;  %s3382_s8 = inlined_call_operand.hbm [shape: f32[1,1,256], index: 8, kind: output, shape index: {2}]  }
   0x1   :  { %15 = vsyncpa [#allocation6], 0 }
   0x2   :  { %16 = vsyncpa [#allocation4], 0 }
   0x3   :  { %17 = vsyncpa [#allocation9], 0  ;;  %s2141_s27 = smov [#allocation2]   ;;  %s2023_s9 = scalar_lea.hbm %s3377_s3, 1024 }
   0x4   :  { %s29_s28 = sshll.u32 %s2141_s27, 4  ;;  %p2024_p0 = scmp.ne.s32.totalorder %s3377_s3, %s2023_s9  ;;  %s30_s28 = int_to_ptr.vmem [resolvable:$true] %s29_s28 }
   0x5   :  { %p2027_p1 = scmp.lt.u32.totalorder %s2023_s9, %s3377_s3 }
   0x7   :  { %p2029_p2 = pnand %p2027_p1, %p2024_p0 }
   0x9   :  { %2032 = shalt.err (!%p2029_p2)
}
   0xa   :  { %s2033_s14 = scalar_lea.vmem %s30_s28, 1024  ;;  %p2038_p4 = scmp.lt.s32.totalorder %s30_s28, %s30_s28 }
   0xb   :  { %p2034_p3 = scmp.ne.s32.totalorder %s30_s28, %s2033_s14  ;;  %p2039_p5 = scmp.lt.s32.totalorder %s2033_s14, %s2033_s14 }
   0xd   :  { %p2040_p6 = por %p2039_p5, %p2038_p4 }
   0xf   :  { %p2041_p7 = pnand %p2040_p6, %p2034_p3 }
  0x11   :  { %2044 = shalt.err (!%p2041_p7)
}
  0x12   :  { %s2142_s15 = smov 256   ;;  %s2143_s16 = smov 16  }
  0x13   :  { %35 = dma.hbm_to_vmem [thread:$0]  %s3377_s3, 1024, %s30_s28, [#allocation3], %s2142_s15, %s2142_s15, %s2143_s16  }
  0x14   :  { %s2144_s19 = smov [#allocation5]   ;;  %s2045_s23 = scalar_lea.hbm %s3378_s4, 4096 }
  0x15   :  { %s41_s20 = sshll.u32 %s2144_s19, 4  ;;  %p2046_p8 = scmp.ne.s32.totalorder %s3378_s4, %s2045_s23  ;;  %s42_s20 = int_to_ptr.vmem [resolvable:$true] %s41_s20 }
  0x16   :  { %p2049_p9 = scmp.lt.u32.totalorder %s2045_s23, %s3378_s4 }
  0x18   :  { %p2051_p10 = pnand %p2049_p9, %p2046_p8 }
  0x1a   :  { %2054 = shalt.err (!%p2051_p10)
}
  0x1b   :  { %s2055_s29 = scalar_lea.vmem %s42_s20, 4096  ;;  %p2060_p12 = scmp.lt.s32.totalorder %s42_s20, %s42_s20 }
  0x1c   :  { %p2056_p11 = scmp.ne.s32.totalorder %s42_s20, %s2055_s29  ;;  %p2061_p13 = scmp.lt.s32.totalorder %s2055_s29, %s2055_s29 }
  0x1e   :  { %p2062_p0 = por %p2061_p13, %p2060_p12 }
  0x20   :  { %p2063_p1 = pnand %p2062_p0, %p2056_p11 }
  0x22   :  { %2066 = shalt.err (!%p2063_p1)
}
  0x23   :  { %s2145_s3 = smov 128   ;;  %s2146_s28 = smov 8  }
  0x24   :  { %47 = dma.hbm_to_vmem [thread:$0]  %s3378_s4, 4096, %s42_s20, [#allocation6], %s2145_s3, %s2145_s3, %s2146_s28  }
  0x25   :  { %2133 = dma.done.wait [#allocation3], 1024  }
  0x26   :  { %2134 = vsyncadd [#allocation3], 4294966272 }
  0x27   :  { %2135 = dma.done.wait [#allocation6], 4096  }
  0x28   :  { %2136 = vsyncadd [#allocation6], 4294963200  ;;  %v2147_v0 = vmov 0   ;;  %v2229_v1 = vld [vmem:[%s3376_s2 + $0x8] sm:$0xff]  ;;  %v2234_v2 = vld [vmem:[%s3376_s2 + $0x18] sm:$0xff]  ;;  %vm168_vm0 = vcmask 261120  }
  0x29   :  { %213 = vmatprep.mubr.bf16.mxu0 %v2147_v0  ;;  %327 = vmatprep.mubr.bf16.mxu1 %v2147_v0  ;;  %v2239_v3 = vld [vmem:[%s3376_s2 + $0x28] sm:$0xff]  ;;  %v2244_v4 = vld [vmem:[%s3376_s2 + $0x38] sm:$0xff]  ;;  %v67_v5 = vmul.f32 %v2229_v1, %v2229_v1  ;;  %v69_v6 = vmul.f32 %v2234_v2, %v2234_v2  ;;  %v2255_v8 = vld [vmem:[%s3376_s2] sm:$0xff]  ;;  %vm282_vm1 = vcmask 130048  }
  0x2a   :  { %v71_v7 = vmul.f32 %v2239_v3, %v2239_v3  ;;  %v2260_v9 = vld [vmem:[%s3376_s2 + $0x10] sm:$0xff]  ;;  %v2265_v10 = vld [vmem:[%s3376_s2 + $0x20] sm:$0xff]  ;;  %v66_v12 = vmul.f32 %v2255_v8, %v2255_v8  ;;  %v73_v14 = vmul.f32 %v2244_v4, %v2244_v4  ;;  %v2285_v20 = vld [vmem:[%s3376_s2 + $0x48] sm:$0xff] }
  0x2b   :  { %v2270_v11 = vld [vmem:[%s3376_s2 + $0x30] sm:$0xff]  ;;  %v68_v13 = vmul.f32 %v2260_v9, %v2260_v9  ;;  %v83_v15 = vadd.f32 %v69_v6, %v67_v5  ;;  %v70_v16 = vmul.f32 %v2265_v10, %v2265_v10  ;;  %v2290_v22 = vld [vmem:[%s3376_s2 + $0x58] sm:$0xff]  ;;  %v2295_v23 = vld [vmem:[%s3376_s2 + $0x68] sm:$0xff]  ;;  %v730_v25 = vmul.f32 %v2285_v20, %v2285_v20 }
  0x2c   :  { %v72_v17 = vmul.f32 %v2270_v11, %v2270_v11  ;;  %v2300_v24 = vld [vmem:[%s3376_s2 + $0x78] sm:$0xff]  ;;  %v732_v27 = vmul.f32 %v2290_v22, %v2290_v22  ;;  %v734_v28 = vmul.f32 %v2295_v23, %v2295_v23  ;;  %v2311_v29 = vld [vmem:[%s3376_s2 + $0x40] sm:$0xff]  ;;  %v2316_v30 = vld [vmem:[%s3376_s2 + $0x50] sm:$0xff] }
  0x2d   :  { %v74_v18 = vadd.f32 %v68_v13, %v66_v12  ;;  %v84_v19 = vadd.f32 %v83_v15, %v71_v7  ;;  %v2321_v31 = vld [vmem:[%s3376_s2 + $0x60] sm:$0xff]  ;;  %v2326_v33 = vld [vmem:[%s3376_s2 + $0x70] sm:$0xff]  ;;  %v729_v34 = vmul.f32 %v2311_v29, %v2311_v29  ;;  %v731_v35 = vmul.f32 %v2316_v30, %v2316_v30  ;;  %v2338_v49 = vld [vmem:[#allocation2 + $0x8] sm:$0xff] }
  0x2e   :  { %v733_v36 = vmul.f32 %v2321_v31, %v2321_v31  ;;  %v736_v38 = vmul.f32 %v2300_v24, %v2300_v24  ;;  %v746_v39 = vadd.f32 %v732_v27, %v730_v25  ;;  %v735_v41 = vmul.f32 %v2326_v33, %v2326_v33  ;;  %v2340_v50 = vld [vmem:[#allocation2 + $0x18] sm:$0xff]  ;;  %v2346_v55 = vld [vmem:[#allocation2] sm:$0xff]  ;;  %v2348_v56 = vld [vmem:[#allocation2 + $0x10] sm:$0xff] }
  0x2f   :  { %v75_v21 = vadd.f32 %v74_v18, %v70_v16  ;;  %v85_v26 = vadd.f32 %v84_v19, %v73_v14  ;;  %v737_v42 = vadd.f32 %v731_v35, %v729_v34  ;;  %v113_v53 = vmul.f32 %v2338_v49, %v2338_v49 }
  0x30   :  { %v747_v44 = vadd.f32 %v746_v39, %v734_v28  ;;  %v115_v54 = vmul.f32 %v2340_v50, %v2340_v50  ;;  %v112_v59 = vmul.f32 %v2346_v55, %v2346_v55  ;;  %v114_v60 = vmul.f32 %v2348_v56, %v2348_v56 }
  0x31   :  { %v76_v32 = vadd.f32 %v75_v21, %v72_v17  ;;  %v86_v37 = vrot.slane %v85_v26, 4  ;;  %v738_v46 = vadd.f32 %v737_v42, %v733_v36 }
  0x32   :  { %v748_v48 = vadd.f32 %v747_v44, %v736_v38  ;;  %v123_v63 = vadd.f32 %v115_v54, %v113_v53  ;;  %v116_v7 = vadd.f32 %v114_v60, %v112_v59  ;;  %v2364_v54 = vld [vmem:[#allocation2 + $0x30] sm:$0xff] }
  0x33   :  { %v77_v40 = vrot.slane %v76_v32, 4  ;;  %v87_v43 = vadd.f32 %v86_v37, %v85_v26  ;;  %v739_v52 = vadd.f32 %v738_v46, %v735_v41  ;;  %v2356_v46 = vld [vmem:[#allocation2 + $0x38] sm:$0xff]  ;;  %v778_v59 = vmul.f32 %v2364_v54, %v2364_v54 }
  0x34   :  { %v749_v58 = vrot.slane %v748_v48, 4  ;;  %v124_v14 = vrot.slane %v123_v63, 4  ;;  %v117_v17 = vrot.slane %v116_v7, 4  ;;  %v779_v53 = vmul.f32 %v2356_v46, %v2356_v46 }
  0x35   :  { %v78_v45 = vadd.f32 %v77_v40, %v76_v32  ;;  %v88_v47 = vrot.slane %v87_v43, 2  ;;  %v740_v62 = vrot.slane %v739_v52, 4 }
  0x36   :  { %v750_v6 = vadd.f32 %v749_v58, %v748_v48  ;;  %v125_v21 = vadd.f32 %v124_v14, %v123_v63  ;;  %v118_v27 = vadd.f32 %v117_v17, %v116_v7 }
  0x37   :  { %v79_v51 = vrot.slane %v78_v45, 2  ;;  %v89_v57 = vadd.f32 %v88_v47, %v87_v43  ;;  %v741_v13 = vadd.f32 %v740_v62, %v739_v52  ;;  %v2358_v47 = vld [vmem:[#allocation2 + $0x20] sm:$0xff] }
  0x38   :  { %v751_v16 = vrot.slane %v750_v6, 2  ;;  %v126_v34 = vrot.slane %v125_v21, 2  ;;  %v119_v36 = vrot.slane %v118_v27, 2  ;;  %v776_v58 = vmul.f32 %v2358_v47, %v2358_v47 }
  0x39   :  { %v80_v61 = vadd.f32 %v79_v51, %v78_v45  ;;  %v90_v5 = vrot.slane %v89_v57, 1  ;;  %v742_v19 = vrot.slane %v741_v13, 2  ;;  %v2354_v45 = vld [vmem:[#allocation2 + $0x28] sm:$0xff] }
  0x3a   :  { %v752_v26 = vadd.f32 %v751_v16, %v750_v6  ;;  %v127_v38 = vadd.f32 %v126_v34, %v125_v21  ;;  %v120_v40 = vadd.f32 %v119_v36, %v118_v27  ;;  %v777_v52 = vmul.f32 %v2354_v45, %v2354_v45 }
  0x3b   :  { %v81_v12 = vrot.slane %v80_v61, 1  ;;  %v91_v15 = vadd.f32 %v90_v5, %v89_v57  ;;  %v743_v32 = vadd.f32 %v742_v19, %v741_v13  ;;  %v780_v63 = vadd.f32 %v778_v59, %v776_v58  ;;  %v2406_v58 = vld [vmem:[#allocation5 + $0x14] ss:$8 sps:$4 sm:$0xff]  }
  0x3c   :  { %v753_v35 = vrot.slane %v752_v26, 1  ;;  %v128_v42 = vrot.slane %v127_v38, 1  ;;  %v121_v44 = vrot.slane %v120_v40, 1 }
  0x3d   :  { %v82_v18 = vadd.f32 %v81_v12, %v80_v61  ;;  %v93_v25 = vmax.f32 %v91_v15, 1e-24  ;;  %v744_v37 = vrot.slane %v743_v32, 1  ;;  %v787_v61 = vadd.f32 %v779_v53, %v777_v52  ;;  %v2394_v52 = vld [vmem:[#allocation5 + $0x4] ss:$8 sps:$4 sm:$0xff]  }
  0x3e   :  { %v754_v39 = vadd.f32 %v753_v35, %v752_v26  ;;  %v129_v51 = vadd.f32 %v128_v42, %v127_v38  ;;  %v122_v57 = vadd.f32 %v121_v44, %v120_v40  ;;  %v781_v7 = vrot.slane %v780_v63, 4  ;;  %v1943_v35 = vld [vmem:[%s3374_s0] sm:$0xff]  }
  0x3f   :  { %v92_v28 = vmax.f32 %v82_v18, 1e-24  ;;  %2007 = vrsqrt.f32 %v93_v25  ;;  %v745_v41 = vadd.f32 %v744_v37, %v743_v32  ;;  %v788_v5 = vrot.slane %v787_v61, 4 }
  0x40   :  { %v756_v43 = vmax.f32 %v754_v39, 1e-24  ;;  %v131_v60 = vmax.f32 %v129_v51, 1e-24  ;;  %v130_v62 = vmax.f32 %v122_v57, 1e-24 }
  0x41   :  { %2009 = vrsqrt.f32 %v92_v28  ;;  %v755_v48 = vmax.f32 %v745_v41, 1e-24  ;;  %v789_v27 = vadd.f32 %v788_v5, %v787_v61  ;;  %v782_v28 = vadd.f32 %v781_v7, %v780_v63  ;;  %v2415_v61 = vld [vmem:[#allocation5 + $0x24] ss:$8 sps:$4 sm:$0xff]   ;;  %v2422_v5 = vld [vmem:[#allocation5 + $0x20] ss:$8 sps:$4 sm:$0xff]  }
  0x42   :  { %2011 = vrsqrt.f32 %v756_v43  ;;  %v1983_v63 = vld [vmem:[%s3375_s1 + $0x8] sm:$0xff]   ;;  %v2428_v7 = vld [vmem:[#allocation5 + $0x34] ss:$8 sps:$4 sm:$0xff]  }
  0x43   :  { %2013 = vrsqrt.f32 %v755_v48 }
  0x44   :  { %2015 = vrsqrt.f32 %v131_v60  ;;  %v2410_v60 = vld [vmem:[#allocation5 + $0x10] ss:$8 sps:$4 sm:$0xff]  }
  0x45   :  { %2017 = vrsqrt.f32 %v130_v62 }
  0x49   :  { %v2008_v6 = vpop.eup %2007 }
  0x4a   :  { %v97_v13 = vmul.f32 %v2008_v6, %v2229_v1  ;;  %v99_v14 = vmul.f32 %v2008_v6, %v2234_v2  ;;  %v101_v15 = vmul.f32 %v2008_v6, %v2239_v3  ;;  %v103_v16 = vmul.f32 %v2008_v6, %v2244_v4  ;;  %v1945_v6 = vld [vmem:[%s3374_s0 + $0x10] sm:$0xff]  }
  0x4b   :  { %v2010_v12 = vpop.eup %2009  ;;  %v790_v1 = vrot.slane %v789_v27, 2  ;;  %v783_v2 = vrot.slane %v782_v28, 2 }
  0x4c   :  { %v96_v17 = vmul.f32 %v2010_v12, %v2255_v8  ;;  %v98_v18 = vmul.f32 %v2010_v12, %v2260_v9  ;;  %v100_v19 = vmul.f32 %v2010_v12, %v2265_v10  ;;  %v102_v21 = vmul.f32 %v2010_v12, %v2270_v11  ;;  %v2012_v34 = vpop.eup %2011 }
  0x4d   :  { %v105_v25 = vpack.c.bf16 %v99_v14, %v97_v13  ;;  %v107_v26 = vpack.c.bf16 %v103_v16, %v101_v15  ;;  %v2014_v4 = vpop.eup %2013  ;;  %v760_v8 = vmul.f32 %v2012_v34, %v2285_v20  ;;  %v762_v9 = vmul.f32 %v2012_v34, %v2290_v22  ;;  %v2432_v13 = vld [vmem:[#allocation5 + $0x30] ss:$8 sps:$4 sm:$0xff]   ;;  %v2439_v16 = vld [vmem:[#allocation5 + $0x44] ss:$8 sps:$4 sm:$0xff]  }
  0x4e   :  { %v104_v32 = vpack.c.bf16 %v98_v18, %v96_v17  ;;  %v106_v3 = vpack.c.bf16 %v102_v21, %v100_v19  ;;  %v764_v10 = vmul.f32 %v2012_v34, %v2295_v23  ;;  %v766_v11 = vmul.f32 %v2012_v34, %v2300_v24  ;;  %v2016_v38 = vpop.eup %2015  ;;  %v1990_v18 = vld [vmem:[%s3375_s1 + $0x10] sm:$0xff]  }
  0x4f   :  { %181 = vmatprep.subr.bf16.mxu0 %v105_v25  ;;  %v759_v36 = vmul.f32 %v2014_v4, %v2311_v29  ;;  %v761_v37 = vmul.f32 %v2014_v4, %v2316_v30  ;;  %v768_v39 = vpack.c.bf16 %v762_v9, %v760_v8  ;;  %v763_v40 = vmul.f32 %v2014_v4, %v2321_v31  ;;  %v2018_v22 = vpop.eup %2017  ;;  %v2452_v19 = vld [vmem:[#allocation5 + $0x54] ss:$8 sps:$4 sm:$0xff]   ;;  %v2456_v25 = vld [vmem:[#allocation5 + $0x50] ss:$8 sps:$4 sm:$0xff]   ;;  %v1948_v8 = vld [vmem:[%s3374_s0 + $0x28] sm:$0xff]  }
  0x50   :  { %182 = vmatpush1.bf16.msra.mxu0 %v104_v32  ;;  %v791_v20 = vadd.f32 %v790_v1, %v789_v27  ;;  %v784_v41 = vadd.f32 %v783_v2, %v782_v28  ;;  %v765_v24 = vmul.f32 %v2014_v4, %v2326_v33  ;;  %v135_v42 = vmul.f32 %v2016_v38, %v2338_v49  ;;  %v1951_v49 = vld [vmem:[%s3375_s1] sm:$0xff]   ;;  %v1997_v32 = vld [vmem:[%s3375_s1 + $0x18] sm:$0xff]  }
  0x51   :  { %183 = vmatprep.subr.bf16.mxu0 %v107_v26  ;;  %v767_v23 = vpack.c.bf16 %v761_v37, %v759_v36  ;;  %v137_v43 = vmul.f32 %v2016_v38, %v2340_v50  ;;  %v770_v44 = vpack.c.bf16 %v766_v11, %v764_v10  ;;  %v134_v29 = vmul.f32 %v2018_v22, %v2346_v55  ;;  %v2400_v55 = vld [vmem:[#allocation5] ss:$8 sps:$4 sm:$0xff]   ;;  %v2461_v26 = vld [vmem:[#allocation5 + $0x64] ss:$8 sps:$4 sm:$0xff]   ;;  %v2476_v34 = vld [vmem:[#allocation5 + $0x74] ss:$8 sps:$4 sm:$0xff]  }
  0x52   :  { %v136_v30 = vmul.f32 %v2018_v22, %v2348_v56  ;;  %v792_v48 = vrot.slane %v791_v20, 1  ;;  %v785_v57 = vrot.slane %v784_v41, 1  ;;  %v769_v33 = vpack.c.bf16 %v765_v24, %v763_v40  ;;  %v1944_v56 = vld [vmem:[%s3374_s0 + $0x8] sm:$0xff]   ;;  %v1947_v2 = vld [vmem:[%s3374_s0 + $0x20] sm:$0xff]   ;;  %v2495_v9 = vld [vmem:[#allocation5 + $0x94] ss:$8 sps:$4 sm:$0xff]  }
  0x53   :  { %v139_v51 = vpack.c.bf16 %v137_v43, %v135_v42  ;;  %v2470_v1 = vld [vmem:[#allocation5 + $0x60] ss:$8 sps:$4 sm:$0xff]   ;;  %v2498_v10 = vld [vmem:[#allocation5 + $0x90] ss:$8 sps:$4 sm:$0xff]   ;;  %v2502_v11 = vld [vmem:[#allocation5 + $0xa4] ss:$8 sps:$4 sm:$0xff]  }
  0x54   :  { %184 = vmatpush1.bf16.msra.mxu0 %v106_v3  ;;  %v138_v31 = vpack.c.bf16 %v136_v30, %v134_v29  ;;  %v793_v53 = vadd.f32 %v792_v48, %v791_v20  ;;  %v786_v59 = vadd.f32 %v785_v57, %v784_v41  ;;  %v2489_v4 = vld [vmem:[#allocation5 + $0x80] ss:$8 sps:$4 sm:$0xff]   ;;  %v1949_v36 = vld [vmem:[%s3374_s0 + $0x30] sm:$0xff]   ;;  %v1950_v20 = vld [vmem:[%s3374_s0 + $0x38] sm:$0xff]  }
  0x55   :  { %845 = vmatprep.subr.bf16.mxu0 %v768_v39  ;;  %295 = vmatprep.subr.bf16.mxu1 %v139_v51  ;;  %v2512_v37 = vld [vmem:[#allocation5 + $0xb4] ss:$8 sps:$4 sm:$0xff]   ;;  %v2515_v38 = vld [vmem:[#allocation5 + $0xb0] ss:$8 sps:$4 sm:$0xff]   ;;  %v2519_v39 = vld [vmem:[#allocation5 + $0xc4] ss:$8 sps:$4 sm:$0xff]  }
  0x56   :  { %v795_v50 = vmax.f32 %v793_v53, 1e-24  ;;  %296 = vmatpush1.bf16.msra.mxu1 %v138_v31  ;;  %v794_v62 = vmax.f32 %v786_v59, 1e-24  ;;  %v2523_v40 = vld [vmem:[#allocation5 + $0xc0] ss:$8 sps:$4 sm:$0xff]  }
  0x57   :  { %1784 = vmatmul.mubr.msk.bf16.vlgmr.msra.gmra.mrb[0].mxu0 %vm168_vm0, %v1943_v35  ;;  %584 = vmatprep.subr.bf16.mxu1 %v2394_v52  ;;  %v2506_v35 = vld [vmem:[#allocation5 + $0xa0] ss:$8 sps:$4 sm:$0xff]   ;;  %v2529_v41 = vld [vmem:[#allocation5 + $0xd4] ss:$8 sps:$4 sm:$0xff]   ;;  %v2532_v22 = vld [vmem:[#allocation5 + $0xd0] ss:$8 sps:$4 sm:$0xff]  }
  0x58   :  { %223 = vmatprep.mubr.bf16.mxu0 %v2147_v0  ;;  %846 = vmatpush1.bf16.msra.mxu0 %v767_v23  ;;  %2019 = vrsqrt.f32 %v795_v50  ;;  %v2536_v23 = vld [vmem:[#allocation5 + $0xe4] ss:$8 sps:$4 sm:$0xff]   ;;  %v2540_v24 = vld [vmem:[#allocation5 + $0xe0] ss:$8 sps:$4 sm:$0xff]   ;;  %v2559_v43 = vld [vmem:[#allocation5 + $0xf4] ss:$8 sps:$4 sm:$0xff]  }
  0x59   :  { %847 = vmatprep.subr.bf16.mxu0 %v770_v44  ;;  %1792 = vmatmul.mubr.msk.bf16.vlgmr.msra.gmra.mrb[0].mxu1 %vm282_vm1, %v1951_v49  ;;  %2021 = vrsqrt.f32 %v794_v62  ;;  %v1979_v42 = vld [vmem:[%s3375_s1 + $0x20] sm:$0xff]   ;;  %v2561_v44 = vld [vmem:[#allocation5 + $0xf0] ss:$8 sps:$4 sm:$0xff]   ;;  %v2004_v29 = vld [vmem:[%s3375_s1 + $0x28] sm:$0xff]  }
  0x5a   :  { %585 = vmatpush1.bf16.msra.mxu1 %v2400_v55  ;;  %337 = vmatprep.mubr.bf16.mxu1 %v2147_v0  ;;  %v2005_v30 = vld [vmem:[%s3375_s1 + $0x30] sm:$0xff]   ;;  %v2006_v48 = vld [vmem:[%s3375_s1 + $0x38] sm:$0xff]   ;;  %s2148_s1 = smov [#allocation8]  }
  0x5b   :  { %586 = vmatprep.subr.bf16.mxu1 %v2406_v58  ;;  %s1750_s29 = sshll.u32 %s2148_s1, 4  ;;  %s1751_s29 = int_to_ptr.vmem [resolvable:$true] %s1750_s29 }
  0x5c   :  { %848 = vmatpush1.bf16.msra.mxu0 %v769_v33  ;;  %s2067_s3 = scalar_lea.vmem %s1751_s29, 4096  ;;  %p2072_p3 = scmp.lt.s32.totalorder %s1751_s29, %s1751_s29 }
  0x5d   :  { %p2068_p2 = scmp.ne.s32.totalorder %s1751_s29, %s2067_s3  ;;  %p2073_p4 = scmp.lt.s32.totalorder %s2067_s3, %s2067_s3 }
  0x5e   :  { %587 = vmatpush1.bf16.msra.mxu1 %v2410_v60 }
  0x5f   :  { %1785 = vmatmul.mubr.msk.bf16.gmra.mrb[4].mxu0 %vm168_vm0, %v1944_v56  ;;  %588 = vmatprep.subr.bf16.mxu1 %v2415_v61  ;;  %p2074_p5 = por %p2073_p4, %p2072_p3 }
  0x60   :  { %233 = vmatprep.mubr.bf16.mxu0 %v2147_v0 }
  0x61   :  { %1793 = vmatmul.mubr.msk.bf16.gmra.mrb[4].mxu1 %vm282_vm1, %v1983_v63  ;;  %p2075_p6 = pnand %p2074_p5, %p2068_p2 }
  0x62   :  { %v2020_v12 = vpop.eup %2019  ;;  %589 = vmatpush1.bf16.msra.mxu1 %v2422_v5  ;;  %347 = vmatprep.mubr.bf16.mxu1 %v2147_v0 }
  0x63   :  { %v799_v14 = vmul.f32 %v2020_v12, %v2354_v45  ;;  %v801_v15 = vmul.f32 %v2020_v12, %v2356_v46  ;;  %590 = vmatprep.subr.bf16.mxu1 %v2428_v7  ;;  %v2446_v45 = vld [vmem:[#allocation5 + $0x40] ss:$8 sps:$4 sm:$0xff]   ;;  %v1946_v46 = vld [vmem:[%s3374_s0 + $0x18] sm:$0xff]   ;;  %v2022_v21 = vpop.eup %2021 }
  0x64   :  { %v798_v27 = vmul.f32 %v2022_v21, %v2358_v47  ;;  %v800_v28 = vmul.f32 %v2022_v21, %v2364_v54  ;;  %v2480_v47 = vld [vmem:[#allocation5 + $0x70] ss:$8 sps:$4 sm:$0xff]   ;;  %v2484_v54 = vld [vmem:[#allocation5 + $0x84] ss:$8 sps:$4 sm:$0xff]  }
  0x65   :  { %v803_v17 = vpack.c.bf16 %v801_v15, %v799_v14 }
  0x66   :  { %591 = vmatpush1.bf16.msra.mxu1 %v2432_v13  ;;  %v802_v3 = vpack.c.bf16 %v800_v28, %v798_v27 }
  0x67   :  { %1786 = vmatmul.mubr.msk.bf16.gmra.mrb[8].mxu0 %vm168_vm0, %v1945_v6  ;;  %959 = vmatprep.subr.bf16.mxu0 %v803_v17 }
  0x68   :  { %243 = vmatprep.mubr.bf16.mxu0 %v2147_v0  ;;  %592 = vmatprep.subr.bf16.mxu1 %v2439_v16 }
  0x69   :  { %1794 = vmatmul.mubr.msk.bf16.gmra.mrb[8].mxu1 %vm282_vm1, %v1990_v18 }
  0x6a   :  { %593 = vmatpush1.bf16.msra.mxu1 %v2446_v45  ;;  %357 = vmatprep.mubr.bf16.mxu1 %v2147_v0 }
  0x6b   :  { %594 = vmatprep.subr.bf16.mxu1 %v2452_v19 }
  0x6e   :  { %595 = vmatpush1.bf16.msra.mxu1 %v2456_v25 }
  0x6f   :  { %1787 = vmatmul.mubr.msk.bf16.gmra.mrb[12].mxu0 %vm168_vm0, %v1946_v46  ;;  %596 = vmatprep.subr.bf16.mxu1 %v2461_v26 }
  0x70   :  { %877 = vmatprep.mubr.bf16.mxu0 %v2147_v0 }
  0x71   :  { %1795 = vmatmul.mubr.msk.bf16.gmra.mrb[12].mxu1 %vm282_vm1, %v1997_v32 }
  0x72   :  { %597 = vmatpush1.bf16.msra.mxu1 %v2470_v1 }
  0x73   :  { %598 = vmatprep.subr.bf16.mxu1 %v2476_v34 }
  0x76   :  { %599 = vmatpush1.bf16.msra.mxu1 %v2480_v47 }
  0x77   :  { %1848 = vmatmul.mubr.msk.bf16.vlgmr.msra.gmra.mrb[16].mxu0 %vm168_vm0, %v1947_v2  ;;  %600 = vmatprep.subr.bf16.mxu1 %v2484_v54 }
  0x78   :  { %887 = vmatprep.mubr.bf16.mxu0 %v2147_v0  ;;  %960 = vmatpush1.bf16.msra.mxu0 %v802_v3 }
  0x79   :  { %1249 = vmatprep.subr.bf16.mxu0 %v2394_v52 }
  0x7a   :  { %601 = vmatpush1.bf16.msra.mxu1 %v2489_v4 }
  0x7b   :  { %602 = vmatprep.subr.bf16.mxu1 %v2495_v9 }
  0x7e   :  { %603 = vmatpush1.bf16.msra.mxu1 %v2498_v10 }
  0x7f   :  { %1849 = vmatmul.mubr.msk.bf16.gmra.mrb[20].mxu0 %vm168_vm0, %v1948_v8  ;;  %604 = vmatprep.subr.bf16.mxu1 %v2502_v11 }
  0x80   :  { %897 = vmatprep.mubr.bf16.mxu0 %v2147_v0 }
  0x82   :  { %605 = vmatpush1.bf16.msra.mxu1 %v2506_v35 }
  0x83   :  { %606 = vmatprep.subr.bf16.mxu1 %v2512_v37 }
  0x86   :  { %607 = vmatpush1.bf16.msra.mxu1 %v2515_v38 }
  0x87   :  { %1850 = vmatmul.mubr.msk.bf16.gmra.mrb[24].mxu0 %vm168_vm0, %v1949_v36  ;;  %608 = vmatprep.subr.bf16.mxu1 %v2519_v39 }
  0x88   :  { %907 = vmatprep.mubr.bf16.mxu0 %v2147_v0 }
  0x8a   :  { %609 = vmatpush1.bf16.msra.mxu1 %v2523_v40 }
  0x8b   :  { %610 = vmatprep.subr.bf16.mxu1 %v2529_v41 }
  0x8e   :  { %611 = vmatpush1.bf16.msra.mxu1 %v2532_v22 }
  0x8f   :  { %1851 = vmatmul.mubr.msk.bf16.gmra.mrb[28].mxu0 %vm168_vm0, %v1950_v20  ;;  %612 = vmatprep.subr.bf16.mxu1 %v2536_v23 }
  0x90   :  { %991 = vmatprep.mubr.bf16.mxu0 %v2147_v0 }
  0x92   :  { %613 = vmatpush1.bf16.msra.mxu1 %v2540_v24 }
  0x93   :  { %614 = vmatprep.subr.bf16.mxu1 %v2559_v43 }
  0x96   :  { %615 = vmatpush1.bf16.msra.mxu1 %v2561_v44 }
  0x97   :  { %1864 = vmatmul.mubr.msk.bf16.vlgmr.msra.gmra.mrb[32].mxu0 %vm282_vm1, %v1979_v42  ;;  %1900 = vmatprep.subr.bf16.mxu1 %v2394_v52 }
  0x98   :  { %1250 = vmatpush1.bf16.msra.mxu0 %v2400_v55  ;;  %1001 = vmatprep.mubr.bf16.mxu0 %v2147_v0 }
  0x99   :  { %1251 = vmatprep.subr.bf16.mxu0 %v2406_v58 }
  0x9c   :  { %1252 = vmatpush1.bf16.msra.mxu0 %v2410_v60 }
  0x9d   :  { %1253 = vmatprep.subr.bf16.mxu0 %v2415_v61 }
  0x9f   :  { %1865 = vmatmul.mubr.msk.bf16.gmra.mrb[36].mxu0 %vm282_vm1, %v2004_v29 }
  0xa0   :  { %1254 = vmatpush1.bf16.msra.mxu0 %v2422_v5  ;;  %1011 = vmatprep.mubr.bf16.mxu0 %v2147_v0 }
  0xa1   :  { %1255 = vmatprep.subr.bf16.mxu0 %v2428_v7 }
  0xa4   :  { %1256 = vmatpush1.bf16.msra.mxu0 %v2432_v13 }
  0xa5   :  { %1257 = vmatprep.subr.bf16.mxu0 %v2439_v16 }
  0xa7   :  { %1866 = vmatmul.mubr.msk.bf16.gmra.mrb[40].mxu0 %vm282_vm1, %v2005_v30 }
  0xa8   :  { %1258 = vmatpush1.bf16.msra.mxu0 %v2446_v45  ;;  %1021 = vmatprep.mubr.bf16.mxu0 %v2147_v0 }
  0xa9   :  { %1259 = vmatprep.subr.bf16.mxu0 %v2452_v19 }
  0xac   :  { %1260 = vmatpush1.bf16.msra.mxu0 %v2456_v25 }
  0xad   :  { %1261 = vmatprep.subr.bf16.mxu0 %v2461_v26 }
  0xaf   :  { %1867 = vmatmul.mubr.msk.bf16.gmra.mrb[44].mxu0 %vm282_vm1, %v2006_v48 }
  0xb0   :  { %1262 = vmatpush1.bf16.msra.mxu0 %v2470_v1 }
  0xb1   :  { %1263 = vmatprep.subr.bf16.mxu0 %v2476_v34 }
  0xb4   :  { %1264 = vmatpush1.bf16.msra.mxu0 %v2480_v47 }
  0xb5   :  { %1265 = vmatprep.subr.bf16.mxu0 %v2484_v54 }
  0xb8   :  { %1266 = vmatpush1.bf16.msra.mxu0 %v2489_v4 }
  0xb9   :  { %1267 = vmatprep.subr.bf16.mxu0 %v2495_v9 }
  0xbc   :  { %1268 = vmatpush1.bf16.msra.mxu0 %v2498_v10 }
  0xbd   :  { %1269 = vmatprep.subr.bf16.mxu0 %v2502_v11 }
  0xc0   :  { %1270 = vmatpush1.bf16.msra.mxu0 %v2506_v35 }
  0xc1   :  { %1271 = vmatprep.subr.bf16.mxu0 %v2512_v37 }
  0xc4   :  { %1272 = vmatpush1.bf16.msra.mxu0 %v2515_v38 }
  0xc5   :  { %1273 = vmatprep.subr.bf16.mxu0 %v2519_v39 }
  0xc8   :  { %1274 = vmatpush1.bf16.msra.mxu0 %v2523_v40 }
  0xc9   :  { %1275 = vmatprep.subr.bf16.mxu0 %v2529_v41 }
  0xcc   :  { %1276 = vmatpush1.bf16.msra.mxu0 %v2532_v22 }
  0xcd   :  { %1277 = vmatprep.subr.bf16.mxu0 %v2536_v23 }
  0xd0   :  { %1278 = vmatpush1.bf16.msra.mxu0 %v2540_v24 }
  0xd1   :  { %1279 = vmatprep.subr.bf16.mxu0 %v2559_v43 }
  0xd4   :  { %1280 = vmatpush1.bf16.msra.mxu0 %v2561_v44 }
 0x12a   :  { %v2601_v0 = vpop.f32.mrb[0].mxu0 }
 0x12b   :  { %3437 = vst [vmem:[#allocation15_spill] sm:$0xff] %v2601_v0  ;;  %v2603_v51 = vpop.f32.mrb[1].mxu0 }
 0x12c   :  { %3438 = vst [vmem:[#allocation16_spill] sm:$0xff] %v2603_v51  ;;  %v2605_v31 = vpop.f32.mrb[2].mxu0  ;;  %v2613_v33 = vpop.f32.mrb[0].mxu1 }
 0x12d   :  { %v384_v52 = vpack.c.bf16 %v2605_v31, %v2601_v0  ;;  %v2609_v53 = vpop.f32.mrb[3].mxu0  ;;  %368 = vst [vmem:[#allocation8] sm:$0xff] %v2613_v33  ;;  %v2616_v49 = vpop.f32.mrb[1].mxu1 }
 0x12e   :  { %3439 = vst [vmem:[#allocation17_spill] sm:$0xff] %v2609_v53  ;;  %v385_v57 = vpack.c.bf16 %v2609_v53, %v2603_v51  ;;  %369 = vst [vmem:[#allocation8 + $0x8] sm:$0xff] %v2616_v49  ;;  %v2622_v56 = vpop.f32.mrb[2].mxu1 }
 0x12f   :  { %370 = vst [vmem:[#allocation8 + $0x10] sm:$0xff] %v2622_v56  ;;  %v2628_v62 = vpop.f32.mrb[3].mxu1 }
 0x130   :  { %616 = vmatprep.mubr.bf16.mxu1 %v385_v57  ;;  %371 = vst [vmem:[#allocation8 + $0x18] sm:$0xff] %v2628_v62 }
 0x131   :  { %617 = vmatmul.mubr.bf16.vlgmr.msra.gmra.mrb[16].mxu1 %v384_v52 }
 0x132   :  { %1916 = vmatpush1.bf16.msra.mxu1 %v2400_v55  ;;  %v2619_v50 = vpop.f32.mrb[4].mxu0 }
 0x133   :  { %v2624_v59 = vpop.f32.mrb[5].mxu0  ;;  %1901 = vmatprep.subr.bf16.mxu1 %v2406_v58 }
 0x134   :  { %3440 = vst [vmem:[#allocation18_spill] sm:$0xff] %v2624_v59  ;;  %v2630_v63 = vpop.f32.mrb[6].mxu0  ;;  %v2641_v58 = vpop.f32.mrb[4].mxu1 }
 0x135   :  { %v386_v55 = vpack.c.bf16 %v2630_v63, %v2619_v50  ;;  %v2635_v6 = vpop.f32.mrb[7].mxu0  ;;  %372 = vst [vmem:[#allocation8 + $0x20] sm:$0xff] %v2641_v58  ;;  %v2644_v14 = vpop.f32.mrb[5].mxu1 }
 0x136   :  { %3441 = vst [vmem:[#allocation19_spill] sm:$0xff] %v2635_v6  ;;  %v387_v12 = vpack.c.bf16 %v2635_v6, %v2624_v59  ;;  %1917 = vmatpush1.bf16.msra.mxu1 %v2410_v60  ;;  %373 = vst [vmem:[#allocation8 + $0x28] sm:$0xff] %v2644_v14  ;;  %v2650_v17 = vpop.f32.mrb[6].mxu1 }
 0x137   :  { %1902 = vmatprep.subr.bf16.mxu1 %v2415_v61  ;;  %374 = vst [vmem:[#allocation8 + $0x30] sm:$0xff] %v2650_v17  ;;  %v2656_v60 = vpop.f32.mrb[7].mxu1 }
 0x138   :  { %626 = vmatprep.mubr.bf16.mxu1 %v387_v12  ;;  %375 = vst [vmem:[#allocation8 + $0x38] sm:$0xff] %v2656_v60 }
 0x139   :  { %627 = vmatmul.mubr.bf16.gmra.mrb[20].mxu1 %v386_v55 }
 0x13a   :  { %1918 = vmatpush1.bf16.msra.mxu1 %v2422_v5  ;;  %v2647_v15 = vpop.f32.mrb[8].mxu0 }
 0x13b   :  { %v2652_v18 = vpop.f32.mrb[9].mxu0  ;;  %1903 = vmatprep.subr.bf16.mxu1 %v2428_v7 }
 0x13c   :  { %3442 = vst [vmem:[#allocation20_spill] sm:$0xff] %v2652_v18  ;;  %v2658_v61 = vpop.f32.mrb[10].mxu0  ;;  %v2669_v7 = vpop.f32.mrb[8].mxu1 }
 0x13d   :  { %v388_v5 = vpack.c.bf16 %v2658_v61, %v2647_v15  ;;  %v2663_v46 = vpop.f32.mrb[11].mxu0  ;;  %376 = vst [vmem:[#allocation8 + $0x40] sm:$0xff] %v2669_v7  ;;  %v2672_v27 = vpop.f32.mrb[9].mxu1 }
 0x13e   :  { %3443 = vst [vmem:[#allocation21_spill] sm:$0xff] %v2663_v46  ;;  %v389_v21 = vpack.c.bf16 %v2663_v46, %v2652_v18  ;;  %1919 = vmatpush1.bf16.msra.mxu1 %v2432_v13  ;;  %377 = vst [vmem:[#allocation8 + $0x48] sm:$0xff] %v2672_v27  ;;  %v2678_v32 = vpop.f32.mrb[10].mxu1 }
 0x13f   :  { %1904 = vmatprep.subr.bf16.mxu1 %v2439_v16  ;;  %378 = vst [vmem:[#allocation8 + $0x50] sm:$0xff] %v2678_v32  ;;  %v2684_v13 = vpop.f32.mrb[11].mxu1 }
 0x140   :  { %636 = vmatprep.mubr.bf16.mxu1 %v389_v21  ;;  %379 = vst [vmem:[#allocation8 + $0x58] sm:$0xff] %v2684_v13 }
 0x141   :  { %637 = vmatmul.mubr.bf16.gmra.mrb[24].mxu1 %v388_v5 }
 0x142   :  { %1920 = vmatpush1.bf16.msra.mxu1 %v2446_v45  ;;  %v2675_v28 = vpop.f32.mrb[12].mxu0 }
 0x143   :  { %v2680_v2 = vpop.f32.mrb[13].mxu0  ;;  %1905 = vmatprep.subr.bf16.mxu1 %v2452_v19 }
 0x144   :  { %3444 = vst [vmem:[#allocation22_spill] sm:$0xff] %v2680_v2  ;;  %v2686_v16 = vpop.f32.mrb[14].mxu0  ;;  %v2697_v19 = vpop.f32.mrb[12].mxu1 }
 0x145   :  { %v390_v45 = vpack.c.bf16 %v2686_v16, %v2675_v28  ;;  %v2691_v3 = vpop.f32.mrb[15].mxu0  ;;  %380 = vst [vmem:[#allocation8 + $0x60] sm:$0xff] %v2697_v19  ;;  %v2700_v36 = vpop.f32.mrb[13].mxu1 }
 0x146   :  { %3445 = vst [vmem:[#allocation23_spill] sm:$0xff] %v2691_v3  ;;  %v391_v8 = vpack.c.bf16 %v2691_v3, %v2680_v2  ;;  %1921 = vmatpush1.bf16.msra.mxu1 %v2456_v25  ;;  %381 = vst [vmem:[#allocation8 + $0x68] sm:$0xff] %v2700_v36  ;;  %v2706_v42 = vpop.f32.mrb[14].mxu1 }
 0x147   :  { %1906 = vmatprep.subr.bf16.mxu1 %v2461_v26  ;;  %382 = vst [vmem:[#allocation8 + $0x70] sm:$0xff] %v2706_v42  ;;  %v2712_v25 = vpop.f32.mrb[15].mxu1 }
 0x148   :  { %646 = vmatprep.mubr.bf16.mxu1 %v391_v8  ;;  %383 = vst [vmem:[#allocation8 + $0x78] sm:$0xff] %v2712_v25 }
 0x149   :  { %647 = vmatmul.mubr.bf16.gmra.mrb[28].mxu1 %v390_v45 }
 0x14a   :  { %1922 = vmatpush1.bf16.msra.mxu1 %v2470_v1  ;;  %v2703_v20 = vpop.f32.mrb[16].mxu0 }
 0x14b   :  { %v2708_v29 = vpop.f32.mrb[17].mxu0  ;;  %1907 = vmatprep.subr.bf16.mxu1 %v2476_v34 }
 0x14c   :  { %3446 = vst [vmem:[#allocation24_spill] sm:$0xff] %v2708_v29  ;;  %v2714_v26 = vpop.f32.mrb[18].mxu0 }
 0x14d   :  { %v1049_v1 = vpack.c.bf16 %v2714_v26, %v2703_v20  ;;  %v2719_v30 = vpop.f32.mrb[19].mxu0 }
 0x14e   :  { %3447 = vst [vmem:[#allocation25_spill] sm:$0xff] %v2719_v30  ;;  %v1050_v48 = vpack.c.bf16 %v2719_v30, %v2708_v29  ;;  %1923 = vmatpush1.bf16.msra.mxu1 %v2480_v47 }
 0x14f   :  { %1908 = vmatprep.subr.bf16.mxu1 %v2484_v54 }
 0x150   :  { %1281 = vmatprep.mubr.bf16.mxu0 %v1050_v48 }
 0x151   :  { %1282 = vmatmul.mubr.bf16.vlgmr.msra.gmra.mrb[48].mxu0 %v1049_v1 }
 0x152   :  { %1924 = vmatpush1.bf16.msra.mxu1 %v2489_v4  ;;  %v2726_v34 = vpop.f32.mrb[20].mxu0 }
 0x153   :  { %1909 = vmatprep.subr.bf16.mxu1 %v2495_v9  ;;  %v2729_v52 = vpop.f32.mrb[21].mxu0 }
 0x154   :  { %3448 = vst [vmem:[#allocation26_spill] sm:$0xff] %v2729_v52  ;;  %v2731_v57 = vpop.f32.mrb[22].mxu0 }
 0x155   :  { %3449 = vst [vmem:[#allocation27_spill] sm:$0xff] %v2731_v57  ;;  %v1051_v55 = vpack.c.bf16 %v2731_v57, %v2726_v34  ;;  %v2735_v12 = vpop.f32.mrb[23].mxu0 }
 0x156   :  { %3450 = vst [vmem:[#allocation28_spill] sm:$0xff] %v2735_v12  ;;  %1925 = vmatpush1.bf16.msra.mxu1 %v2498_v10  ;;  %v1052_v47 = vpack.c.bf16 %v2735_v12, %v2729_v52 }
 0x157   :  { %1910 = vmatprep.subr.bf16.mxu1 %v2502_v11 }
 0x158   :  { %1291 = vmatprep.mubr.bf16.mxu1 %v1052_v47 }
 0x15a   :  { %1926 = vmatpush1.bf16.msra.mxu1 %v2506_v35  ;;  %v2742_v54 = vpop.f32.mrb[24].mxu0 }
 0x15b   :  { %1911 = vmatprep.subr.bf16.mxu1 %v2512_v37  ;;  %v2745_v4 = vpop.f32.mrb[25].mxu0 }
 0x15c   :  { %3451 = vst [vmem:[#allocation29_spill] sm:$0xff] %v2745_v4  ;;  %v2747_v9 = vpop.f32.mrb[26].mxu0 }
 0x15d   :  { %3452 = vst [vmem:[#allocation30_spill] sm:$0xff] %v2747_v9  ;;  %v1053_v5 = vpack.c.bf16 %v2747_v9, %v2742_v54  ;;  %v2751_v10 = vpop.f32.mrb[27].mxu0 }
 0x15e   :  { %3453 = vst [vmem:[#allocation31_spill] sm:$0xff] %v2751_v10  ;;  %1927 = vmatpush1.bf16.msra.mxu1 %v2515_v38  ;;  %v1054_v11 = vpack.c.bf16 %v2751_v10, %v2745_v4 }
 0x15f   :  { %1912 = vmatprep.subr.bf16.mxu1 %v2519_v39 }
 0x162   :  { %1928 = vmatpush1.bf16.msra.mxu1 %v2523_v40  ;;  %v2758_v35 = vpop.f32.mrb[28].mxu0 }
 0x163   :  { %1913 = vmatprep.subr.bf16.mxu1 %v2529_v41  ;;  %v2761_v37 = vpop.f32.mrb[29].mxu0 }
 0x164   :  { %3454 = vst [vmem:[#allocation32_spill] sm:$0xff] %v2761_v37  ;;  %v2763_v21 = vpop.f32.mrb[30].mxu0 }
 0x165   :  { %v1055_v45 = vpack.c.bf16 %v2763_v21, %v2758_v35  ;;  %v2767_v8 = vpop.f32.mrb[31].mxu0 }
 0x166   :  { %3455 = vst [vmem:[#allocation33_spill] sm:$0xff] %v2767_v8  ;;  %1929 = vmatpush1.bf16.msra.mxu1 %v2532_v22  ;;  %v1056_v38 = vpack.c.bf16 %v2767_v8, %v2761_v37 }
 0x167   :  { %1914 = vmatprep.subr.bf16.mxu1 %v2536_v23 }
 0x16a   :  { %1930 = vmatpush1.bf16.msra.mxu1 %v2540_v24  ;;  %v2776_v39 = vpop.f32.mrb[32].mxu0 }
 0x16b   :  { %1915 = vmatprep.subr.bf16.mxu1 %v2559_v43  ;;  %1033 = vst [vmem:[#allocation8 + $0x80] sm:$0xff] %v2776_v39  ;;  %v2779_v40 = vpop.f32.mrb[33].mxu0 }
 0x16c   :  { %1034 = vst [vmem:[#allocation8 + $0x88] sm:$0xff] %v2779_v40  ;;  %v2782_v41 = vpop.f32.mrb[34].mxu0 }
 0x16d   :  { %1035 = vst [vmem:[#allocation8 + $0x90] sm:$0xff] %v2782_v41  ;;  %v2785_v22 = vpop.f32.mrb[35].mxu0 }
 0x16e   :  { %1931 = vmatpush1.bf16.msra.mxu1 %v2561_v44  ;;  %1036 = vst [vmem:[#allocation8 + $0x98] sm:$0xff] %v2785_v22 }
 0x171   :  { %1292 = vmatmul.mubr.bf16.vlgmr.msra.gmra.mrb[32].mxu1 %v1051_v55 }
 0x172   :  { %1301 = vmatprep.mubr.bf16.mxu1 %v1054_v11  ;;  %v2788_v23 = vpop.f32.mrb[36].mxu0 }
 0x173   :  { %1037 = vst [vmem:[#allocation8 + $0xa0] sm:$0xff] %v2788_v23  ;;  %v2791_v24 = vpop.f32.mrb[37].mxu0 }
 0x174   :  { %3456 = vst [vmem:[#allocation34_spill] sm:$0xff] %v2791_v24  ;;  %1038 = vst [vmem:[#allocation8 + $0xa8] sm:$0xff] %v2791_v24  ;;  %v2794_v43 = vpop.f32.mrb[38].mxu0 }
 0x175   :  { %1039 = vst [vmem:[#allocation8 + $0xb0] sm:$0xff] %v2794_v43  ;;  %v2797_v44 = vpop.f32.mrb[39].mxu0 }
 0x176   :  { %3457 = vst [vmem:[#allocation35_spill] sm:$0xff] %v2797_v44  ;;  %1040 = vst [vmem:[#allocation8 + $0xb8] sm:$0xff] %v2797_v44 }
 0x179   :  { %1302 = vmatmul.mubr.bf16.gmra.mrb[36].mxu1 %v1053_v5 }
 0x17a   :  { %1311 = vmatprep.mubr.bf16.mxu1 %v1056_v38  ;;  %v2800_v1 = vpop.f32.mrb[40].mxu0 }
 0x17b   :  { %3458 = vst [vmem:[#allocation36_spill] sm:$0xff] %v2800_v1  ;;  %1041 = vst [vmem:[#allocation8 + $0xc0] sm:$0xff] %v2800_v1  ;;  %v2803_v48 = vpop.f32.mrb[41].mxu0 }
 0x17c   :  { %3459 = vst [vmem:[#allocation37_spill] sm:$0xff] %v2803_v48  ;;  %1042 = vst [vmem:[#allocation8 + $0xc8] sm:$0xff] %v2803_v48  ;;  %v2806_v55 = vpop.f32.mrb[42].mxu0 }
 0x17d   :  { %3460 = vst [vmem:[#allocation38_spill] sm:$0xff] %v2806_v55  ;;  %1043 = vst [vmem:[#allocation8 + $0xd0] sm:$0xff] %v2806_v55  ;;  %v2809_v47 = vpop.f32.mrb[43].mxu0 }
 0x17e   :  { %3461 = vst [vmem:[#allocation39_spill] sm:$0xff] %v2809_v47  ;;  %1044 = vst [vmem:[#allocation8 + $0xd8] sm:$0xff] %v2809_v47 }
 0x181   :  { %1312 = vmatmul.mubr.bf16.gmra.mrb[40].mxu1 %v1055_v45 }
 0x182   :  { %v2812_v5 = vpop.f32.mrb[44].mxu0 }
 0x183   :  { %3462 = vst [vmem:[#allocation40_spill] sm:$0xff] %v2812_v5  ;;  %1045 = vst [vmem:[#allocation8 + $0xe0] sm:$0xff] %v2812_v5  ;;  %v2815_v11 = vpop.f32.mrb[45].mxu0 }
 0x184   :  { %3463 = vst [vmem:[#allocation41_spill] sm:$0xff] %v2815_v11  ;;  %1046 = vst [vmem:[#allocation8 + $0xe8] sm:$0xff] %v2815_v11  ;;  %v2818_v45 = vpop.f32.mrb[46].mxu0 }
 0x185   :  { %3464 = vst [vmem:[#allocation42_spill] sm:$0xff] %v2818_v45  ;;  %1047 = vst [vmem:[#allocation8 + $0xf0] sm:$0xff] %v2818_v45  ;;  %v2821_v38 = vpop.f32.mrb[47].mxu0 }
 0x186   :  { %3465 = vst [vmem:[#allocation43_spill] sm:$0xff] %v2821_v38  ;;  %1048 = vst [vmem:[#allocation8 + $0xf8] sm:$0xff] %v2821_v38 }
 0x204   :  { %v2824_v48 = vpop.f32.mrb[16].mxu1 }
 0x205   :  { %3466 = vst [vmem:[#allocation44_spill] sm:$0xff] %v2824_v48  ;;  %v2828_v44 = vpop.f32.mrb[17].mxu1 }
 0x206   :  { %3467 = vst [vmem:[#allocation45_spill] sm:$0xff] %v2828_v44  ;;  %v2832_v5 = vpop.f32.mrb[18].mxu1 }
 0x207   :  { %3468 = vst [vmem:[#allocation46_spill] sm:$0xff] %v2832_v5  ;;  %v657_v11 = vadd.f32 %v2832_v5, %v2824_v48  ;;  %v2838_v55 = vpop.f32.mrb[19].mxu1 }
 0x208   :  { %3469 = vst [vmem:[#allocation47_spill] sm:$0xff] %v2838_v55  ;;  %v670_v38 = vadd.f32 %v2838_v55, %v2828_v44 }
 0x20c   :  { %v2844_v0 = vpop.f32.mrb[20].mxu1 }
 0x20d   :  { %v658_v24 = vadd.f32 %v657_v11, %v2844_v0  ;;  %v2849_v1 = vpop.f32.mrb[21].mxu1 }
 0x20e   :  { %3470 = vst [vmem:[#allocation48_spill] sm:$0xff] %v2849_v1  ;;  %v671_v48 = vadd.f32 %v670_v38, %v2849_v1  ;;  %v2854_v5 = vpop.f32.mrb[22].mxu1 }
 0x20f   :  { %v659_v44 = vadd.f32 %v658_v24, %v2854_v5  ;;  %v2859_v55 = vpop.f32.mrb[23].mxu1 }
 0x210   :  { %3471 = vst [vmem:[#allocation49_spill] sm:$0xff] %v2859_v55  ;;  %v672_v11 = vadd.f32 %v671_v48, %v2859_v55 }
 0x214   :  { %v2864_v53 = vpop.f32.mrb[24].mxu1 }
 0x215   :  { %v660_v38 = vadd.f32 %v659_v44, %v2864_v53  ;;  %v2869_v1 = vpop.f32.mrb[25].mxu1 }
 0x216   :  { %3472 = vst [vmem:[#allocation50_spill] sm:$0xff] %v2869_v1  ;;  %v673_v24 = vadd.f32 %v672_v11, %v2869_v1  ;;  %v2874_v48 = vpop.f32.mrb[26].mxu1 }
 0x217   :  { %v661_v51 = vadd.f32 %v660_v38, %v2874_v48  ;;  %v2879_v55 = vpop.f32.mrb[27].mxu1 }
 0x218   :  { %3473 = vst [vmem:[#allocation51_spill] sm:$0xff] %v2879_v55 }
 0x219   :  { %2078 = shalt.err (!%p2075_p6)
}
 0x21a   :  { %s2079_s9 = scalar_lea.hbm %s3381_s7, 4096 }
 0x21b   :  { %p2080_p7 = scmp.ne.s32.totalorder %s3381_s7, %s2079_s9  ;;  %p2083_p8 = scmp.lt.u32.totalorder %s2079_s9, %s3381_s7 }
 0x21d   :  { %p2085_p9 = pnand %p2083_p8, %p2080_p7 }
 0x21f   :  { %2088 = shalt.err (!%p2085_p9)
}
 0x220   :  { %1756 = dma.vmem_to_hbm [thread:$0]  %s1751_s29, 4096, %s3381_s7, [#allocation9], %s2142_s15, %s2142_s15, %s2143_s16   ;;  %v674_v11 = vadd.f32 %v673_v24, %v2879_v55  ;;  %v2899_v47 = vpop.f32.mrb[28].mxu1  ;;  %v1419_v30 = vmax.f32 %v2613_v33, 0.0  ;;  %v1586_v10 = vmax.f32 %v2776_v39, 0.0 }
 0x221   :  { %v662_v44 = vadd.f32 %v661_v51, %v2899_v47  ;;  %v2904_v1 = vpop.f32.mrb[29].mxu1 }
 0x222   :  { %3474 = vst [vmem:[#allocation52_spill] sm:$0xff] %v2904_v1  ;;  %v675_v18 = vadd.f32 %v674_v11, %v2904_v1  ;;  %v2909_v59 = vpop.f32.mrb[30].mxu1 }
 0x223   :  { %v663_v24 = vadd.f32 %v662_v44, %v2909_v59  ;;  %v2914_v55 = vpop.f32.mrb[31].mxu1 }
 0x224   :  { %3475 = vst [vmem:[#allocation53_spill] sm:$0xff] %v2914_v55  ;;  %v676_v51 = vadd.f32 %v675_v18, %v2914_v55  ;;  %v2919_v46 = vpop.f32.mrb[48].mxu0  ;;  %v1420_v18 = vmax.f32 %v2616_v49, 0.0  ;;  %v1422_v49 = vmax.f32 %v2628_v62, 0.0  ;;  %v2986_v62 = vsub.f32 0.0, %v1419_v30 }
 0x225   :  { %3476 = vst [vmem:[#allocation54_spill] sm:$0xff] %v2919_v46  ;;  %v2923_v6 = vpop.f32.mrb[49].mxu0  ;;  %v1429_v30 = vmax.f32 %v2678_v32, 0.0 }
 0x226   :  { %3477 = vst [vmem:[#allocation55_spill] sm:$0xff] %v2923_v6  ;;  %v2927_v1 = vpop.f32.mrb[50].mxu0 }
 0x227   :  { %3478 = vst [vmem:[#allocation56_spill] sm:$0xff] %v2927_v1  ;;  %v1322_v38 = vadd.f32 %v2927_v1, %v2919_v46  ;;  %v2933_v2 = vpop.f32.mrb[51].mxu0 }
 0x228   :  { %3479 = vst [vmem:[#allocation57_spill] sm:$0xff] %v2933_v2  ;;  %v1335_v45 = vadd.f32 %v2933_v2, %v2923_v6 }
 0x244   :  { %v2939_v55 = vpop.f32.mrb[32].mxu1 }
 0x245   :  { %v1323_v44 = vadd.f32 %v1322_v38, %v2939_v55  ;;  %v2944_v3 = vpop.f32.mrb[33].mxu1 }
 0x246   :  { %3480 = vst [vmem:[#allocation58_spill] sm:$0xff] %v2944_v3  ;;  %v1336_v46 = vadd.f32 %v1335_v45, %v2944_v3  ;;  %v2949_v1 = vpop.f32.mrb[34].mxu1  ;;  %v664_v3 = vrot.slane %v663_v24, 4 }
 0x247   :  { %3481 = vst [vmem:[#allocation59_spill] sm:$0xff] %v2949_v1  ;;  %v1324_v6 = vadd.f32 %v1323_v44, %v2949_v1  ;;  %v2954_v2 = vpop.f32.mrb[35].mxu1  ;;  %v1421_v1 = vmax.f32 %v2622_v56, 0.0  ;;  %v1424_v56 = vmax.f32 %v2644_v14, 0.0  ;;  %v2992_v44 = vsub.f32 0.0, %v1422_v49 }
 0x248   :  { %3482 = vst [vmem:[#allocation60_spill] sm:$0xff] %v2954_v2  ;;  %v1337_v38 = vadd.f32 %v1336_v46, %v2954_v2  ;;  %v677_v46 = vrot.slane %v676_v51, 4  ;;  %v1423_v2 = vmax.f32 %v2641_v58, 0.0  ;;  %v2988_v58 = vsub.f32 0.0, %v1420_v18 }
 0x249   :  { %3487 = vst [vmem:[#allocation65_spill] sm:$0xff] %v2992_v44  ;;  %v1426_v14 = vmax.f32 %v2656_v60, 0.0  ;;  %v3029_v60 = vsub.f32 0.0, %v1429_v30  ;;  %v1434_v30 = vmax.f32 %v2712_v25, 0.0 }
 0x24a   :  { %v678_v4 = vadd.f32 %v677_v46, %v676_v51 }
 0x24c   :  { %v2960_v45 = vpop.f32.mrb[36].mxu1  ;;  %v679_v46 = vrot.slane %v678_v4, 2 }
 0x24d   :  { %3483 = vst [vmem:[#allocation61_spill] sm:$0xff] %v2960_v45  ;;  %v1325_v52 = vadd.f32 %v1324_v6, %v2960_v45  ;;  %v2966_v11 = vpop.f32.mrb[37].mxu1 }
 0x24e   :  { %3484 = vst [vmem:[#allocation62_spill] sm:$0xff] %v2966_v11  ;;  %v1338_v57 = vadd.f32 %v1337_v38, %v2966_v11  ;;  %v2972_v29 = vpop.f32.mrb[38].mxu1  ;;  %v1425_v38 = vmax.f32 %v2650_v17, 0.0  ;;  %v665_v11 = vadd.f32 %v664_v3, %v663_v24  ;;  %v1427_v17 = vmax.f32 %v2669_v7, 0.0 }
 0x24f   :  { %3485 = vst [vmem:[#allocation63_spill] sm:$0xff] %v2972_v29  ;;  %v1326_v6 = vadd.f32 %v1325_v52, %v2972_v29  ;;  %v2979_v12 = vpop.f32.mrb[39].mxu1  ;;  %v2990_v52 = vsub.f32 0.0, %v1421_v1  ;;  %v2994_v29 = vsub.f32 0.0, %v1423_v2  ;;  %v1428_v3 = vmax.f32 %v2672_v27, 0.0 }
 0x250   :  { %3486 = vst [vmem:[#allocation64_spill] sm:$0xff] %v2979_v12  ;;  %v1339_v45 = vadd.f32 %v1338_v57, %v2979_v12  ;;  %v2998_v57 = vsub.f32 0.0, %v1424_v56  ;;  %v3000_v9 = vsub.f32 0.0, %v1425_v38  ;;  %v1430_v1 = vmax.f32 %v2684_v13, 0.0 }
 0x251   :  { %v666_v51 = vrot.slane %v665_v11, 2  ;;  %v1431_v7 = vmax.f32 %v2697_v19, 0.0  ;;  %v3018_v56 = vsub.f32 0.0, %v1426_v14  ;;  %v3020_v13 = vsub.f32 0.0, %v1427_v17 }
 0x252   :  { %3488 = vst [vmem:[#allocation66_spill] sm:$0xff] %v2998_v57  ;;  %v3027_v19 = vsub.f32 0.0, %v1428_v3  ;;  %v3034_v14 = vsub.f32 0.0, %v1430_v1  ;;  %v1432_v17 = vmax.f32 %v2700_v36, 0.0  ;;  %v1433_v38 = vmax.f32 %v2706_v42, 0.0 }
 0x253   :  { %3490 = vst [vmem:[#allocation68_spill] sm:$0xff] %v3018_v56  ;;  %v3037_v37 = vsub.f32 0.0, %v1431_v7  ;;  %v680_v12 = vadd.f32 %v679_v46, %v678_v4  ;;  %v1587_v1 = vmax.f32 %v2779_v40, 0.0  ;;  %v1589_v27 = vmax.f32 %v2785_v22, 0.0 }
 0x254   :  { %v3004_v24 = vpop.f32.mrb[40].mxu1  ;;  %3492 = vst [vmem:[#allocation70_spill] sm:$0xff] %v3027_v19  ;;  %3493 = vst [vmem:[#allocation71_spill] sm:$0xff] %v3034_v14  ;;  %v1590_v36 = vmax.f32 %v2788_v23, 0.0  ;;  %v1592_v42 = vmax.f32 %v2794_v43, 0.0  ;;  %v3047_v4 = vsub.f32 0.0, %v1432_v17 }
 0x255   :  { %v1327_v2 = vadd.f32 %v1326_v6, %v3004_v24  ;;  %v3010_v18 = vpop.f32.mrb[41].mxu1  ;;  %v3049_v25 = vsub.f32 0.0, %v1433_v38  ;;  %v681_v39 = vrot.slane %v680_v12, 1 }
 0x256   :  { %3489 = vst [vmem:[#allocation67_spill] sm:$0xff] %v3010_v18  ;;  %v1340_v49 = vadd.f32 %v1339_v45, %v3010_v18  ;;  %v3016_v32 = vpop.f32.mrb[42].mxu1  ;;  %v667_v18 = vadd.f32 %v666_v51, %v665_v11  ;;  %3494 = vst [vmem:[#allocation72_spill] sm:$0xff] %v3047_v4  ;;  %v3057_v23 = vsub.f32 0.0, %v1590_v36  ;;  %v3066_v8 = vsub.f32 0.0, %v1592_v42  ;;  %v3506_v42 = vld [vmem:[#allocation39_spill] sm:$0xff] }
 0x257   :  { %v1328_v6 = vadd.f32 %v1327_v2, %v3016_v32  ;;  %v3025_v33 = vpop.f32.mrb[43].mxu1  ;;  %v1597_v56 = vmax.f32 %v3506_v42, 0.0 }
 0x258   :  { %3491 = vst [vmem:[#allocation69_spill] sm:$0xff] %v3025_v33  ;;  %v1341_v45 = vadd.f32 %v1340_v49, %v3025_v33  ;;  %v1588_v49 = vmax.f32 %v2782_v41, 0.0  ;;  %v668_v51 = vrot.slane %v667_v18, 1  ;;  %v3435_v33 = vlaneseq }
 0x259   :  { %v1329_v2 = vrot.slane %v1328_v6, 4  ;;  %v3051_v41 = vsub.f32 0.0, %v1434_v30  ;;  %v682_v30 = vadd.f32 %v681_v39, %v680_v12 }
 0x25a   :  { %v1342_v3 = vrot.slane %v1341_v45, 4  ;;  %v3055_v40 = vsub.f32 0.0, %v1588_v49  ;;  %v669_v43 = vadd.f32 %v668_v51, %v667_v18  ;;  %v3064_v38 = vshrl.u32 %v3435_v33, 7  ;;  %v3500_v49 = vld [vmem:[#allocation38_spill] sm:$0xff]  ;;  %v3505_v33 = vld [vmem:[#allocation37_spill] sm:$0xff] }
 0x25b   :  { %v1330_v19 = vadd.f32 %v1329_v2, %v1328_v6  ;;  %3495 = vst [vmem:[#allocation73_spill] sm:$0xff] %v3051_v41  ;;  %v3053_v6 = vsub.f32 0.0, %v1586_v10  ;;  %v3059_v2 = vsub.f32 0.0, %v1587_v1  ;;  %v3499_v10 = vld [vmem:[#allocation36_spill] sm:$0xff]  ;;  %v1596_v4 = vmax.f32 %v3500_v49, 0.0  ;;  %v3502_v1 = vld [vmem:[#allocation34_spill] sm:$0xff] }
 0x25c   :  { %v1343_v11 = vadd.f32 %v1342_v3, %v1341_v45  ;;  %v3061_v3 = vsub.f32 0.0, %v1589_v27  ;;  %3498 = vst [vmem:[#allocation76_spill] sm:$0xff] %v3064_v38  ;;  %v1594_v41 = vmax.f32 %v3499_v10, 0.0  ;;  %v3503_v27 = vld [vmem:[#allocation35_spill] sm:$0xff]  ;;  %v3504_v18 = vld [vmem:[#allocation42_spill] sm:$0xff]  ;;  %v1595_v14 = vmax.f32 %v3505_v33, 0.0 }
 0x25d   :  { %v1331_v7 = vrot.slane %v1330_v19, 2  ;;  %3496 = vst [vmem:[#allocation74_spill] sm:$0xff] %v3059_v2  ;;  %v1600_v51 = vmax.f32 %v3504_v18, 0.0  ;;  %v684_v12 = vmul.f32 0.015625, %v669_v43  ;;  %v1470_v10 = vsub.s32 0, %v3064_v38  ;;  %v3507_v49 = vld [vmem:[#allocation41_spill] sm:$0xff] }
 0x25e   :  { %v1344_v46 = vrot.slane %v1343_v11, 2  ;;  %3497 = vst [vmem:[#allocation75_spill] sm:$0xff] %v3061_v3  ;;  %v1593_v3 = vmax.f32 %v3503_v27, 0.0  ;;  %v1599_v57 = vmax.f32 %v3507_v49, 0.0  ;;  %v3508_v27 = vld [vmem:[#allocation43_spill] sm:$0xff]  ;;  %v3083_v33 = vsub.f32 0.0, %v1594_v41 }
 0x25f   :  { %v1332_v22 = vadd.f32 %v1331_v7, %v1330_v19  ;;  %v3501_v7 = vld [vmem:[#allocation40_spill] sm:$0xff]  ;;  %v3085_v18 = vsub.f32 0.0, %v1596_v4  ;;  %v3091_v42 = vsub.f32 0.0, %v1600_v51  ;;  %v3509_v51 = vld [vmem:[#allocation15_spill] sm:$0xff] }
 0x260   :  { %v1345_v45 = vadd.f32 %v1344_v46, %v1343_v11  ;;  %v1598_v11 = vmax.f32 %v3501_v7, 0.0  ;;  %v1591_v46 = vmax.f32 %v3502_v1, 0.0  ;;  %v1474_v1 = vsub.s32 1, %v3064_v38 }
 0x261   :  { %v1333_v17 = vrot.slane %v1332_v22, 1  ;;  %v3093_v49 = vsub.f32 0.0, %v1593_v3  ;;  %v3097_v38 = vsub.f32 0.0, %v1595_v14 }
 0x262   :  { %v1346_v19 = vrot.slane %v1345_v45, 1  ;;  %v3087_v43 = vsub.f32 0.0, %v1591_v46  ;;  %v3105_v46 = vsub.f32 0.0, %v1599_v57  ;;  %v3516_v57 = vsub.f32 %v2647_v15, %v2864_v53 }
 0x263   :  { %v1334_v36 = vadd.f32 %v1333_v17, %v1332_v22  ;;  %v685_v22 = vmul.f32 0.015625, %v682_v30  ;;  %v57_v17 = vld [vmem:[%s3379_s5] sm:$0x3]  ;;  %s2149_s5 = smov [#allocation7]  }
 0x264   :  { %v1347_v2 = vadd.f32 %v1346_v19, %v1345_v45  ;;  %v1601_v45 = vmax.f32 %v3508_v27, 0.0  ;;  %v3099_v27 = vsub.f32 0.0, %v1597_v56  ;;  %v3103_v4 = vrot.slane %v57_v17, %v1474_v1  ;;  %s1738_s18 = sshll.u32 %s2149_s5, 4  ;;  %s1739_s18 = int_to_ptr.vmem [resolvable:$true] %s1738_s18 }
 0x265   :  { %v1348_v39 = vmul.f32 0.015625, %v1334_v36  ;;  %v3089_v36 = vsub.f32 0.0, %v1598_v11  ;;  %v3514_v56 = vsub.f32 %v2619_v50, %v2844_v0  ;;  %v3519_v0 = vsub.f32 %v2686_v16, %v2909_v59  ;;  %s2089_s19 = scalar_lea.vmem %s1739_s18, 4096  ;;  %p2094_p11 = scmp.lt.s32.totalorder %s1739_s18, %s1739_s18 }
 0x266   :  { %v1349_v7 = vmul.f32 0.015625, %v1347_v2  ;;  %v3095_v2 = vrot.slane %v57_v17, %v1470_v10  ;;  %v3107_v11 = vsub.f32 0.0, %v1601_v45  ;;  %v3515_v17 = vsub.f32 %v2630_v63, %v2854_v5  ;;  %p2090_p10 = scmp.ne.s32.totalorder %s1739_s18, %s2089_s19  ;;  %p2095_p12 = scmp.lt.s32.totalorder %s2089_s19, %s2089_s19 }
 0x267   :  { %v1350_v19 = vadd.f32 %v1348_v39, %v684_v12  ;;  %v3510_v12 = vld [vmem:[#allocation44_spill] sm:$0xff] }
 0x268   :  { %v1351_v30 = vadd.f32 %v1349_v7, %v685_v22  ;;  %v3511_v39 = vsub.f32 %v3509_v51, %v3510_v12  ;;  %v3512_v22 = vld [vmem:[#allocation46_spill] sm:$0xff]  ;;  %p2096_p13 = por %p2095_p12, %p2094_p11 }
 0x269   :  { %v1385_v44 = vmul.f32 0.5, %v1350_v19  ;;  %v3513_v10 = vsub.f32 %v2605_v31, %v3512_v22  ;;  %v3517_v19 = vsub.f32 %v2658_v61, %v2874_v48  ;;  %v3518_v31 = vsub.f32 %v2675_v28, %v2899_v47 }
 0x26a   :  { %v3101_v41 = vmul.f32 0.5, %v1351_v30  ;;  %p2097_p0 = pnand %p2096_p13, %p2090_p10 }
 0x26b   :  { %v1451_v3 = vadd.f32 %v1385_v44, %v3511_v39  ;;  %v1453_v7 = vadd.f32 %v1385_v44, %v3513_v10  ;;  %v1455_v14 = vadd.f32 %v1385_v44, %v3514_v56  ;;  %v1457_v1 = vadd.f32 %v1385_v44, %v3515_v17  ;;  %v3525_v56 = vld [vmem:[#allocation27_spill] sm:$0xff] }
 0x26c   :  { %v1459_v45 = vadd.f32 %v1385_v44, %v3516_v57  ;;  %v1461_v30 = vadd.f32 %v1385_v44, %v3517_v19  ;;  %v1463_v51 = vadd.f32 %v1385_v44, %v3518_v31  ;;  %v1465_v50 = vadd.f32 %v1385_v44, %v3519_v0  ;;  %v3531_v19 = vld [vmem:[#allocation63_spill] sm:$0xff] }
 0x26d   :  { %v1478_v12 = vsub.f32 %v1451_v3, %v3095_v2  ;;  %v1480_v63 = vsub.f32 %v1453_v7, %v3095_v2  ;;  %v1482_v5 = vsub.f32 %v1455_v14, %v3095_v2  ;;  %v1484_v53 = vsub.f32 %v1457_v1, %v3095_v2  ;;  %v3526_v14 = vld [vmem:[#allocation59_spill] sm:$0xff] }
 0x26e   :  { %v1486_v15 = vsub.f32 %v1459_v45, %v3095_v2  ;;  %v1488_v61 = vsub.f32 %v1461_v30, %v3095_v2  ;;  %v1490_v48 = vsub.f32 %v1463_v51, %v3095_v2  ;;  %v1492_v28 = vsub.f32 %v1465_v50, %v3095_v2  ;;  %v3530_v45 = vld [vmem:[#allocation30_spill] sm:$0xff] }
 0x26f   :  { %v3142_v47 = vmul.f32 %v1478_v12, %v2986_v62  ;;  %v3145_v59 = vmul.f32 %v1480_v63, %v2990_v52  ;;  %v3148_v16 = vmul.f32 %v1482_v5, %v2994_v29  ;;  %v3151_v39 = vmul.f32 %v1484_v53, %v3000_v9  ;;  %v3520_v29 = vld [vmem:[#allocation54_spill] sm:$0xff] }
 0x270   :  { %v3154_v3 = vmul.f32 %v1486_v15, %v3020_v13  ;;  %v3157_v22 = vmul.f32 %v1488_v61, %v3029_v60  ;;  %v3160_v10 = vmul.f32 %v1490_v48, %v3037_v37  ;;  %v3163_v62 = vmul.f32 %v1492_v28, %v3049_v25  ;;  %v3522_v60 = vld [vmem:[#allocation56_spill] sm:$0xff] }
 0x271   :  { %1510 = vst [vmem:[#allocation7] sm:$0xff] %v3142_v47  ;;  %1512 = vst [vmem:[#allocation7 + $0x10] sm:$0xff] %v3145_v59  ;;  %v3521_v9 = vsub.f32 %v2703_v20, %v3520_v29  ;;  %v3523_v13 = vsub.f32 %v2714_v26, %v3522_v60  ;;  %v3524_v25 = vsub.f32 %v2726_v34, %v2939_v55  ;;  %v3528_v20 = vld [vmem:[#allocation61_spill] sm:$0xff]  ;;  %v3541_v60 = vld [vmem:[#allocation18_spill] sm:$0xff] }
 0x272   :  { %1514 = vst [vmem:[#allocation7 + $0x20] sm:$0xff] %v3148_v16  ;;  %1516 = vst [vmem:[#allocation7 + $0x30] sm:$0xff] %v3151_v39  ;;  %v3527_v17 = vsub.f32 %v3525_v56, %v3526_v14  ;;  %v3529_v26 = vsub.f32 %v2742_v54, %v3528_v20  ;;  %v3532_v34 = vsub.f32 %v3530_v45, %v3531_v19  ;;  %v3547_v14 = vld [vmem:[#allocation20_spill] sm:$0xff] }
 0x273   :  { %v1618_v52 = vadd.f32 %v1385_v44, %v3521_v9  ;;  %v1620_v37 = vadd.f32 %v1385_v44, %v3523_v13  ;;  %v1622_v7 = vadd.f32 %v1385_v44, %v3524_v25  ;;  %1518 = vst [vmem:[#allocation7 + $0x40] sm:$0xff] %v3154_v3  ;;  %1520 = vst [vmem:[#allocation7 + $0x50] sm:$0xff] %v3157_v22  ;;  %v3545_v25 = vld [vmem:[#allocation49_spill] sm:$0xff] }
 0x274   :  { %v1624_v1 = vadd.f32 %v1385_v44, %v3527_v17  ;;  %1522 = vst [vmem:[#allocation7 + $0x60] sm:$0xff] %v3160_v10  ;;  %1524 = vst [vmem:[#allocation7 + $0x70] sm:$0xff] %v3163_v62  ;;  %v1626_v57 = vadd.f32 %v1385_v44, %v3529_v26  ;;  %v1628_v55 = vadd.f32 %v1385_v44, %v3532_v34  ;;  %v3548_v17 = vld [vmem:[#allocation50_spill] sm:$0xff]  ;;  %v3550_v26 = vld [vmem:[#allocation21_spill] sm:$0xff] }
 0x275   :  { %v3533_v30 = vsub.f32 %v2758_v35, %v3004_v24  ;;  %v3534_v51 = vsub.f32 %v2763_v21, %v3016_v32  ;;  %v1634_v50 = vsub.f32 %v1618_v52, %v3095_v2  ;;  %v1636_v12 = vsub.f32 %v1620_v37, %v3095_v2  ;;  %v3539_v52 = vld [vmem:[#allocation47_spill] sm:$0xff]  ;;  %v3553_v34 = vld [vmem:[#allocation22_spill] sm:$0xff] }
 0x276   :  { %v1638_v63 = vsub.f32 %v1622_v7, %v3095_v2  ;;  %v1640_v54 = vsub.f32 %v1624_v1, %v3095_v2  ;;  %v1642_v5 = vsub.f32 %v1626_v57, %v3095_v2  ;;  %v1644_v53 = vsub.f32 %v1628_v55, %v3095_v2  ;;  %v3544_v37 = vld [vmem:[#allocation19_spill] sm:$0xff]  ;;  %v3554_v55 = vld [vmem:[#allocation52_spill] sm:$0xff] }
 0x277   :  { %v1630_v31 = vadd.f32 %v1385_v44, %v3533_v30  ;;  %v1632_v0 = vadd.f32 %v1385_v44, %v3534_v51  ;;  %v1650_v24 = vmul.f32 %v1634_v50, %v3053_v6  ;;  %v1652_v21 = vmul.f32 %v1636_v12, %v3055_v40  ;;  %v3536_v40 = vld [vmem:[#allocation45_spill] sm:$0xff]  ;;  %v3551_v57 = vld [vmem:[#allocation51_spill] sm:$0xff] }
 0x278   :  { %v1654_v44 = vmul.f32 %v1638_v63, %v3057_v23  ;;  %v1656_v32 = vmul.f32 %v1640_v54, %v3066_v8  ;;  %v1658_v61 = vmul.f32 %v1642_v5, %v3083_v33  ;;  %v1660_v48 = vmul.f32 %v1644_v53, %v3085_v18  ;;  %v3538_v8 = vld [vmem:[#allocation17_spill] sm:$0xff] }
 0x279   :  { %v1646_v15 = vsub.f32 %v1630_v31, %v3095_v2  ;;  %v1648_v35 = vsub.f32 %v1632_v0, %v3095_v2  ;;  %1666 = vst [vmem:[#allocation7 + $0x80] sm:$0xff] %v1650_v24  ;;  %1668 = vst [vmem:[#allocation7 + $0x90] sm:$0xff] %v1652_v21  ;;  %v1682_v6 = vadd.f32 %v1652_v21, %v1650_v24  ;;  %v3535_v2 = vld [vmem:[#allocation16_spill] sm:$0xff]  ;;  %v3556_v0 = vld [vmem:[#allocation23_spill] sm:$0xff] }
 0x27a   :  { %1670 = vst [vmem:[#allocation7 + $0xa0] sm:$0xff] %v1654_v44  ;;  %1672 = vst [vmem:[#allocation7 + $0xb0] sm:$0xff] %v1656_v32  ;;  %v3537_v9 = vsub.f32 %v3535_v2, %v3536_v40  ;;  %v3540_v33 = vsub.f32 %v3538_v8, %v3539_v52  ;;  %v3546_v7 = vsub.f32 %v3544_v37, %v3545_v25  ;;  %v3557_v50 = vld [vmem:[#allocation53_spill] sm:$0xff]  ;;  %v3561_v52 = vld [vmem:[#allocation68_spill] sm:$0xff] }
 0x27b   :  { %v1662_v28 = vmul.f32 %v1646_v15, %v3089_v36  ;;  %v3213_v29 = vmul.f32 %v1648_v35, %v3091_v42  ;;  %v3542_v36 = vld [vmem:[#allocation48_spill] sm:$0xff]  ;;  %1674 = vst [vmem:[#allocation7 + $0xc0] sm:$0xff] %v1658_v61  ;;  %1676 = vst [vmem:[#allocation7 + $0xd0] sm:$0xff] %v1660_v48  ;;  %v3549_v1 = vsub.f32 %v3547_v14, %v3548_v17  ;;  %v3559_v40 = vld [vmem:[#allocation65_spill] sm:$0xff] }
 0x27c   :  { %v1452_v23 = vadd.f32 %v3101_v41, %v3537_v9  ;;  %v1454_v18 = vadd.f32 %v3101_v41, %v3540_v33  ;;  %v3543_v13 = vsub.f32 %v3541_v60, %v3542_v36  ;;  %v1458_v56 = vadd.f32 %v3101_v41, %v3546_v7  ;;  %v3565_v25 = vld [vmem:[#allocation73_spill] sm:$0xff]  ;;  %v3566_v7 = vld [vmem:[#allocation24_spill] sm:$0xff] }
 0x27d   :  { %1678 = vst [vmem:[#allocation7 + $0xe0] sm:$0xff] %v1662_v28  ;;  %1680 = vst [vmem:[#allocation7 + $0xf0] sm:$0xff] %v3213_v29  ;;  %v1460_v20 = vadd.f32 %v3101_v41, %v3549_v1  ;;  %v3552_v45 = vsub.f32 %v3550_v26, %v3551_v57  ;;  %v3555_v30 = vsub.f32 %v3553_v34, %v3554_v55  ;;  %v3569_v17 = vld [vmem:[#allocation25_spill] sm:$0xff]  ;;  %v3572_v57 = vld [vmem:[#allocation26_spill] sm:$0xff] }
 0x27e   :  { %v1456_v42 = vadd.f32 %v3101_v41, %v3543_v13  ;;  %v1683_v51 = vadd.f32 %v1682_v6, %v1654_v44  ;;  %v3558_v12 = vsub.f32 %v3556_v0, %v3557_v50  ;;  %v1479_v54 = vsub.f32 %v1452_v23, %v3103_v4  ;;  %v3560_v23 = vld [vmem:[#allocation66_spill] sm:$0xff]  ;;  %v3563_v13 = vld [vmem:[#allocation71_spill] sm:$0xff]  ;;  %v3570_v1 = vld [vmem:[#allocation57_spill] sm:$0xff] }
 0x27f   :  { %v1462_v19 = vadd.f32 %v3101_v41, %v3552_v45  ;;  %v1464_v31 = vadd.f32 %v3101_v41, %v3555_v30  ;;  %v1481_v5 = vsub.f32 %v1454_v18, %v3103_v4  ;;  %v1485_v15 = vsub.f32 %v1458_v56, %v3103_v4  ;;  %v3562_v18 = vld [vmem:[#allocation70_spill] sm:$0xff]  ;;  %v3567_v56 = vld [vmem:[#allocation55_spill] sm:$0xff]  ;;  %v3575_v55 = vld [vmem:[#allocation28_spill] sm:$0xff] }
 0x280   :  { %v1466_v63 = vadd.f32 %v3101_v41, %v3558_v12  ;;  %v1483_v53 = vsub.f32 %v1456_v42, %v3103_v4  ;;  %v1487_v35 = vsub.f32 %v1460_v20, %v3103_v4  ;;  %v1684_v21 = vadd.f32 %v1683_v51, %v1656_v32  ;;  %v3564_v42 = vld [vmem:[#allocation72_spill] sm:$0xff]  ;;  %v3573_v45 = vld [vmem:[#allocation58_spill] sm:$0xff]  ;;  %v3578_v50 = vld [vmem:[#allocation29_spill] sm:$0xff] }
 0x281   :  { %v1489_v24 = vsub.f32 %v1462_v19, %v3103_v4  ;;  %v1491_v44 = vsub.f32 %v1464_v31, %v3103_v4  ;;  %v1495_v2 = vmul.f32 %v1479_v54, %v2988_v58  ;;  %v1497_v9 = vmul.f32 %v1481_v5, %v3559_v40  ;;  %v3576_v30 = vld [vmem:[#allocation60_spill] sm:$0xff]  ;;  %v3579_v12 = vld [vmem:[#allocation62_spill] sm:$0xff]  ;;  %v3581_v5 = vld [vmem:[#allocation31_spill] sm:$0xff] }
 0x282   :  { %v1493_v6 = vsub.f32 %v1466_v63, %v3103_v4  ;;  %v3259_v8 = vmul.f32 %v1483_v53, %v3560_v23  ;;  %v3262_v33 = vmul.f32 %v1485_v15, %v3561_v52  ;;  %v3265_v60 = vmul.f32 %v1487_v35, %v3562_v18  ;;  %v3582_v53 = vld [vmem:[#allocation64_spill] sm:$0xff]  ;;  %v3588_v40 = vld [vmem:[#allocation69_spill] sm:$0xff] }
 0x283   :  { %v1685_v36 = vadd.f32 %v1684_v21, %v1658_v61  ;;  %v3268_v32 = vmul.f32 %v1489_v24, %v3563_v13  ;;  %v3271_v37 = vmul.f32 %v1491_v44, %v3564_v42  ;;  %1511 = vst [vmem:[#allocation7 + $0x8] sm:$0xff] %v1495_v2  ;;  %1513 = vst [vmem:[#allocation7 + $0x18] sm:$0xff] %v1497_v9  ;;  %v3584_v24 = vld [vmem:[#allocation32_spill] sm:$0xff]  ;;  %v3585_v21 = vld [vmem:[#allocation67_spill] sm:$0xff] }
 0x284   :  { %v3274_v58 = vmul.f32 %v1493_v6, %v3565_v25  ;;  %1515 = vst [vmem:[#allocation7 + $0x28] sm:$0xff] %v3259_v8  ;;  %1517 = vst [vmem:[#allocation7 + $0x38] sm:$0xff] %v3262_v33  ;;  %v3568_v61 = vsub.f32 %v3566_v7, %v3567_v56  ;;  %v3571_v20 = vsub.f32 %v3569_v17, %v3570_v1  ;;  %v3587_v6 = vld [vmem:[#allocation33_spill] sm:$0xff] }
 0x285   :  { %1519 = vst [vmem:[#allocation7 + $0x48] sm:$0xff] %v3265_v60  ;;  %v3574_v19 = vsub.f32 %v3572_v57, %v3573_v45  ;;  %v3577_v31 = vsub.f32 %v3575_v55, %v3576_v30  ;;  %v1686_v0 = vadd.f32 %v1685_v36, %v1660_v48  ;;  %1521 = vst [vmem:[#allocation7 + $0x58] sm:$0xff] %v3268_v32 }
 0x286   :  { %v1619_v14 = vadd.f32 %v3101_v41, %v3568_v61  ;;  %v1621_v26 = vadd.f32 %v3101_v41, %v3571_v20  ;;  %1523 = vst [vmem:[#allocation7 + $0x68] sm:$0xff] %v3271_v37  ;;  %1525 = vst [vmem:[#allocation7 + $0x78] sm:$0xff] %v3274_v58  ;;  %v3580_v63 = vsub.f32 %v3578_v50, %v3579_v12 }
 0x287   :  { %v1623_v34 = vadd.f32 %v3101_v41, %v3574_v19  ;;  %v1625_v51 = vadd.f32 %v3101_v41, %v3577_v31  ;;  %v3583_v15 = vsub.f32 %v3581_v5, %v3582_v53  ;;  %v3586_v44 = vsub.f32 %v3584_v24, %v3585_v21 }
 0x288   :  { %v1627_v54 = vadd.f32 %v3101_v41, %v3580_v63  ;;  %v3589_v23 = vsub.f32 %v3587_v6, %v3588_v40  ;;  %v1635_v18 = vsub.f32 %v1619_v14, %v3103_v4  ;;  %v1637_v36 = vsub.f32 %v1621_v26, %v3103_v4  ;;  %v3591_v14 = vld [vmem:[#allocation75_spill] sm:$0xff] }
 0x289   :  { %v1629_v35 = vadd.f32 %v3101_v41, %v3583_v15  ;;  %v1631_v48 = vadd.f32 %v3101_v41, %v3586_v44  ;;  %v1639_v13 = vsub.f32 %v1623_v34, %v3103_v4  ;;  %v1687_v42 = vadd.f32 %v1686_v0, %v1662_v28 }
 0x28a   :  { %v1633_v52 = vadd.f32 %v3101_v41, %v3589_v23  ;;  %v1641_v25 = vsub.f32 %v1625_v51, %v3103_v4  ;;  %v1643_v7 = vsub.f32 %v1627_v54, %v3103_v4  ;;  %v3590_v41 = vld [vmem:[#allocation74_spill] sm:$0xff]  ;;  %v1653_v20 = vmul.f32 %v1637_v36, %v3591_v14 }
 0x28b   :  { %v1645_v56 = vsub.f32 %v1629_v35, %v3103_v4  ;;  %v1647_v61 = vsub.f32 %v1631_v48, %v3103_v4  ;;  %v1651_v1 = vmul.f32 %v1635_v18, %v3590_v41  ;;  %v1688_v26 = vadd.f32 %v1687_v42, %v3213_v29 }
 0x28c   :  { %v1649_v17 = vsub.f32 %v1633_v52, %v3103_v4  ;;  %v1655_v28 = vmul.f32 %v1639_v13, %v3087_v43  ;;  %v1657_v57 = vmul.f32 %v1641_v25, %v3093_v49  ;;  %v1659_v45 = vmul.f32 %v1643_v7, %v3097_v38  ;;  %1669 = vst [vmem:[#allocation7 + $0x98] sm:$0xff] %v1653_v20 }
 0x28d   :  { %v1661_v19 = vmul.f32 %v1645_v56, %v3099_v27  ;;  %v1663_v34 = vmul.f32 %v1647_v61, %v3105_v46  ;;  %1667 = vst [vmem:[#allocation7 + $0x88] sm:$0xff] %v1651_v1  ;;  %v1695_v4 = vadd.f32 %v1653_v20, %v1651_v1  ;;  %v1526_v43 = vadd.f32 %v3145_v59, %v3142_v47 }
 0x28e   :  { %v1665_v55 = vmul.f32 %v1649_v17, %v3107_v11  ;;  %1671 = vst [vmem:[#allocation7 + $0xa8] sm:$0xff] %v1655_v28  ;;  %1673 = vst [vmem:[#allocation7 + $0xb8] sm:$0xff] %v1657_v57  ;;  %v1539_v29 = vadd.f32 %v1497_v9, %v1495_v2  ;;  %v1689_v49 = vrot.slane %v1688_v26, 4 }
 0x28f   :  { %1675 = vst [vmem:[#allocation7 + $0xc8] sm:$0xff] %v1659_v45  ;;  %1677 = vst [vmem:[#allocation7 + $0xd8] sm:$0xff] %v1661_v19  ;;  %v1696_v38 = vadd.f32 %v1695_v4, %v1655_v28 }
 0x290   :  { %1679 = vst [vmem:[#allocation7 + $0xe8] sm:$0xff] %v1663_v34  ;;  %1681 = vst [vmem:[#allocation7 + $0xf8] sm:$0xff] %v1665_v55 }
 0x291   :  { %2100 = shalt.err (!%p2097_p0)
}
 0x292   :  { %s2101_s0 = scalar_lea.hbm %s3380_s6, 4096 }
 0x293   :  { %p2102_p1 = scmp.ne.s32.totalorder %s3380_s6, %s2101_s0  ;;  %p2105_p2 = scmp.lt.u32.totalorder %s2101_s0, %s3380_s6 }
 0x295   :  { %p2107_p3 = pnand %p2105_p2, %p2102_p1 }
 0x297   :  { %2110 = shalt.err (!%p2107_p3)
}
 0x298   :  { %1744 = dma.vmem_to_hbm [thread:$0]  %s1739_s18, 4096, %s3380_s6, [#allocation4], %s2142_s15, %s2142_s15, %s2143_s16   ;;  %v1527_v27 = vadd.f32 %v1526_v43, %v3148_v16  ;;  %v1540_v46 = vadd.f32 %v1539_v29, %v3259_v8  ;;  %v1697_v11 = vadd.f32 %v1696_v38, %v1657_v57  ;;  %v1690_v9 = vadd.f32 %v1689_v49, %v1688_v26  ;;  %v3592_v56 = vld [vmem:[#allocation76_spill] sm:$0xff] }
 0x299   :  { %s2151_s6 = smov [#allocation10]   ;;  %v3593_v1 = vlaneseq }
 0x29a   :  { %v1528_v47 = vadd.f32 %v1527_v27, %v3151_v39  ;;  %v1541_v59 = vadd.f32 %v1540_v46, %v3262_v33  ;;  %v1698_v2 = vadd.f32 %v1697_v11, %v1659_v45  ;;  %v1691_v63 = vrot.slane %v1690_v9, 2  ;;  %s1763_s15 = sshll.u32 %s2151_s6, 4  ;;  %s1764_s15 = int_to_ptr.vmem [resolvable:$true] %s1763_s15 }
 0x29b   :  { %vm1730_vm2 = vcmp.lt.s32.totalorder %v3593_v1, 256  ;;  %s2111_s16 = scalar_lea.vmem %s1764_s15, 32  ;;  %p2116_p5 = scmp.lt.s32.totalorder %s1764_s15, %s1764_s15 }
 0x29c   :  { %v1529_v30 = vadd.f32 %v1528_v47, %v3154_v3  ;;  %v1542_v31 = vadd.f32 %v1541_v59, %v3265_v60  ;;  %v1699_v51 = vadd.f32 %v1698_v2, %v1661_v19  ;;  %v1692_v60 = vadd.f32 %v1691_v63, %v1690_v9  ;;  %p2112_p4 = scmp.ne.s32.totalorder %s1764_s15, %s2111_s16  ;;  %p2117_p6 = scmp.lt.s32.totalorder %s2111_s16, %s2111_s16 }
 0x29e   :  { %v1530_v0 = vadd.f32 %v1529_v30, %v3157_v22  ;;  %v1543_v50 = vadd.f32 %v1542_v31, %v3268_v32  ;;  %v1700_v12 = vadd.f32 %v1699_v51, %v1663_v34  ;;  %v1693_v44 = vrot.slane %v1692_v60, 1  ;;  %p2118_p7 = por %p2117_p6, %p2116_p5 }
 0x2a0   :  { %v1531_v16 = vadd.f32 %v1530_v0, %v3160_v10  ;;  %v1544_v8 = vadd.f32 %v1543_v50, %v3271_v37  ;;  %v1701_v39 = vadd.f32 %v1700_v12, %v1665_v55  ;;  %v2150_v10 = vmov 1966171168   ;;  %p2119_p8 = pnand %p2118_p7, %p2112_p4 }
 0x2a1   :  { %v1714_v48 = vunpack.c.l.s4 %v2150_v10 }
 0x2a2   :  { %v1532_v33 = vadd.f32 %v1531_v16, %v3163_v62  ;;  %v1545_v54 = vadd.f32 %v1544_v8, %v3274_v58  ;;  %v1702_v5 = vrot.slane %v1701_v39, 4  ;;  %v1694_v58 = vadd.f32 %v1693_v44, %v1692_v60 }
 0x2a3   :  { %v1715_v18 = vunpack.c.0.s8 %v1714_v48 }
 0x2a4   :  { %v1533_v3 = vrot.slane %v1532_v33, 4  ;;  %v1546_v53 = vrot.slane %v1545_v54, 4  ;;  %v1703_v15 = vadd.f32 %v1702_v5, %v1701_v39 }
 0x2a5   :  { %v1718_v61 = vsub.s32 %v1715_v18, %v3592_v56 }
 0x2a6   :  { %v1534_v35 = vadd.f32 %v1533_v3, %v1532_v33  ;;  %v1547_v22 = vadd.f32 %v1546_v53, %v1545_v54  ;;  %v1704_v24 = vrot.slane %v1703_v15, 2 }
 0x2a8   :  { %v1535_v32 = vrot.slane %v1534_v35, 2  ;;  %v1548_v21 = vrot.slane %v1547_v22, 2  ;;  %v1705_v37 = vadd.f32 %v1704_v24, %v1703_v15 }
 0x2aa   :  { %v1536_v6 = vadd.f32 %v1535_v32, %v1534_v35  ;;  %v1549_v40 = vadd.f32 %v1548_v21, %v1547_v22  ;;  %v1706_v23 = vrot.slane %v1705_v37, 1 }
 0x2ac   :  { %v1537_v62 = vrot.slane %v1536_v6, 1  ;;  %v1550_v52 = vrot.slane %v1549_v40, 1  ;;  %v1707_v36 = vadd.f32 %v1706_v23, %v1705_v37 }
 0x2ae   :  { %v1538_v13 = vadd.f32 %v1537_v62, %v1536_v6  ;;  %v1551_v42 = vadd.f32 %v1550_v52, %v1549_v40 }
 0x2b0   :  { %v1708_v25 = vadd.f32 %v1694_v58, %v1538_v13  ;;  %v1709_v7 = vadd.f32 %v1707_v36, %v1551_v42 }
 0x2b2   :  { %v1712_v17 = vcombine.low %v1708_v25, %v1709_v7 }
 0x2b4   :  { %v1719_v41 = vrot.slane %v1712_v17, %v1718_v61 }
 0x2b6   :  { %v1726_v14 = vrot.slane %v1719_v41, %v1718_v61 }
 0x2b8   :  { %1732 = vst.msk [vmem:[#allocation10] sm:$0x3] %vm1730_vm2, %v1726_v14 }
 0x2b9   :  { %2122 = shalt.err (!%p2119_p8)
}
 0x2ba   :  { %s2123_s29 = scalar_lea.hbm %s3382_s8, 32 }
 0x2bb   :  { %p2124_p9 = scmp.ne.s32.totalorder %s3382_s8, %s2123_s29  ;;  %p2127_p10 = scmp.lt.u32.totalorder %s2123_s29, %s3382_s8 }
 0x2bd   :  { %p2129_p11 = pnand %p2127_p10, %p2124_p9 }
 0x2bf   :  { %2132 = shalt.err (!%p2129_p11)
}
 0x2c0   :  { %1766 = dma.vmem_to_hbm [thread:$0]  %s1764_s15, 32, %s3382_s8, [#allocation9]  }
 0x2c1   :  { %2137 = dma.done.wait [#allocation4], 4096  }
 0x2c2   :  { %2138 = vsyncadd [#allocation4], 4294963200 }
 0x2c3   :  { %2139 = dma.done.wait [#allocation9], 4128  }
 0x2c4   :  { %2140 = vsyncadd [#allocation9], 4294963168 }
 0x2c5   :  { %1776 = vsyncpa [#allocation3], 1 }
 0x2c6   :  { %1777 = vsyncpa [#allocation6], 1 }
 0x2c7   :  { %1778 = vsyncpa [#allocation4], 1 }
 0x2c8   :  { %1779 = vsyncpa [#allocation9], 1 }

</bundles_post_ra>
